<compile_context>
chip_gen: v7x
topology: tpu7x:2x2x1
jax: 0.10.0
libtpu: 0.0.40
codegen_flags: <defaults>
</compile_context>

<pallas_src>
import jax
import jax.numpy as jnp
import numpy as np
from jax import lax
from jax.experimental import pallas as pl
from jax.experimental.pallas import tpu as pltpu


# ----------------------------------------------------------------------------
# Pallas kernel: one batch tile per grid step; the whole WriteUnit forward
# (attention softmax over steps, weighted memory sum, fused matmul, gating)
# runs from VMEM/SMEM.
# ----------------------------------------------------------------------------
def write_unit_kernel(mem_ref,      # [T,   Bt, D] bf16   past memory states
                      ctrl_ref,     # [T+1, Bt, D] bf16   control states
                      retr_ref,     # [Bt, D]      bf16   retrieved
                      w_stack_ref,  # [3D, D]      bf16   [w_cat ; w_mem]
                      b_ref,        # [1, D]       f32    b_cat + b_mem
                      w_attn_ref,   # [1, D]       f32
                      w_ctrl_ref,   # [1, D]       f32
                      b_ctrl_ref,   # (1, 1)       f32    SMEM scalar
                      out_ref):     # [Bt, D]      f32
    T = mem_ref.shape[0]
    Bt, D = out_ref.shape

    prev_mem_bf = mem_ref[T - 1]                       # [Bt, D] bf16
    prev_mem = prev_mem_bf.astype(jnp.float32)         # f32 for the gate blend
    last_c = ctrl_ref[T].astype(jnp.float32)           # [Bt, D]

    # ---- self-attention over past memories (single-pass online softmax) ----
    # Linear(D->1) weight hoisted into last_c; b_attn is constant across the
    # softmax axis and cancels, so it is omitted.  All per-step math stays in
    # the native (sublane=Bt, lane=D) layout; logits are [Bt, 1] lane-reduces.
    lw = last_c * w_attn_ref[...]                      # [Bt, D]

    def step(t, carry):
        m, l, acc = carry
        c_t = ctrl_ref[t].astype(jnp.float32)          # f32 elementwise (v5e-safe)
        logit = jnp.sum(c_t * lw, axis=-1, keepdims=True)          # [Bt, 1]
        m_new = jnp.maximum(m, logit)
        scale = jnp.exp(m - m_new)
        e_t = jnp.exp(logit - m_new)
        l_new = scale * l + e_t
        acc_new = scale * acc + e_t * mem_ref[t].astype(jnp.float32)
        return m_new, l_new, acc_new

    carry0 = (jnp.full((Bt, 1), -jnp.inf, jnp.float32),
              jnp.zeros((Bt, 1), jnp.float32),
              jnp.zeros((Bt, D), jnp.float32))
    _, l_sum, acc = lax.fori_loop(0, T, step, carry0, unroll=True)
    attn_mem = acc * pl.reciprocal(l_sum, approx=True)              # [Bt, D]

    # ---- fused concat + mem Linear: one [Bt,3D] @ [3D,D] bf16 MXU dot ----
    # x_stack = [retrieved | prev_mem | attn_mem], w_stack = [w_cat ; w_mem],
    # bias = b_cat + b_mem  ->  next_mem (pre-gate).
    x_stack = jnp.concatenate(
        [retr_ref[...], prev_mem_bf, attn_mem.astype(jnp.bfloat16)], axis=1)
    next_mem = (jnp.dot(x_stack, w_stack_ref[...],
                        preferred_element_type=jnp.float32)
                + b_ref[...])                                       # [Bt, D]

    # ---- memory gate ----
    gate_logit = (jnp.sum(last_c * w_ctrl_ref[...], axis=-1, keepdims=True)
                  + b_ctrl_ref[0, 0])                               # [Bt, 1]
    gate = jax.nn.sigmoid(gate_logit)

    # gate * prev + (1 - gate) * next  ==  next + gate * (prev - next)
    out_ref[...] = next_mem + gate * (prev_mem - next_mem)


# ----------------------------------------------------------------------------
# Batch-tile selection: largest multiple-of-8 divisor of B that still yields a
# few grid steps (DMA overlap, v7x dual-TC), shrunk further if the
# double-buffered stream tile would blow the VMEM budget.
# ----------------------------------------------------------------------------
def _pick_b_tile(B, T, D, budget_bytes=24 << 20):
    divs = [t for t in range(8, min(B, 128) + 1, 8) if B % t == 0]
    if not divs:
        return B
    target = max(8, B // 4)                      # aim for >= ~4 grid steps
    cand = [t for t in divs if t <= target] or divs[:1]
    bt = cand[-1]

    def stream_tile_bytes(t):
        # double-buffered bf16 memories+controls+retrieved + f32 output tile
        return 2 * ((2 * T + 1) * t * D * 2 + t * D * 2 + t * D * 4)

    while stream_tile_bytes(bt) > budget_bytes and bt > divs[0]:
        bt = max(d for d in divs if d < bt)
    return bt


# ----------------------------------------------------------------------------
# Wrapper
# ----------------------------------------------------------------------------
@jax.jit
def write_unit(memories, retrieved, controls, params):
    """memories: [T,B,D]; retrieved: [B,D]; controls: [T+1,B,D]; all float32."""
    T, B, D = memories.shape
    assert D % 128 == 0, "D must be a multiple of 128 for clean lane tiling"
    assert B % 8 == 0, "B must be a multiple of 8 for clean sublane tiling"
    B_TILE = _pick_b_tile(B, T, D)
    nb = B // B_TILE

    # bf16 streams for the HBM-bound inputs; MXU weights packed once as a
    # single [3D, D] bf16 stack with a combined bias.
    mem_bf = memories.astype(jnp.bfloat16)
    ctrl_bf = controls.astype(jnp.bfloat16)
    retr_bf = retrieved.astype(jnp.bfloat16)
    w_stack = jnp.concatenate([params["w_cat"], params["w_mem"]],
                              axis=0).astype(jnp.bfloat16)           # [3D, D]
    b_comb = params["b_cat"] + params["b_mem"]                       # [1, D]

    resident = lambda i: (0, 0)   # weights/biases: same block every step
    in_specs = [
        pl.BlockSpec((T, B_TILE, D), lambda i: (0, i, 0)),       # memories (bf16)
        pl.BlockSpec((T + 1, B_TILE, D), lambda i: (0, i, 0)),   # controls (bf16)
        pl.BlockSpec((B_TILE, D), lambda i: (i, 0)),             # retrieved (bf16)
        pl.BlockSpec((3 * D, D), resident),                      # w_stack (bf16)
        pl.BlockSpec((1, D), resident),                          # b_cat + b_mem
        pl.BlockSpec((1, D), resident),                          # w_attn
        pl.BlockSpec((1, D), resident),                          # w_ctrl
        pl.BlockSpec(memory_space=pltpu.MemorySpace.SMEM),       # b_ctrl scalar
    ]

    # Explicit VMEM limit: lifts v5e's 16 MiB scoped default when shapes grow,
    # never exceeds v7x's 64 MiB physical VMEM.
    stream_bytes = ((2 * T + 1) * B_TILE * D * 2    # memories + controls (bf16)
                    + B_TILE * D * 2                # retrieved (bf16)
                    + B_TILE * D * 4)               # output (f32)
    weight_bytes = 3 * D * D * 2 + 3 * D * 4 + 4
    vmem_limit = int(min(64 << 20,
                         max(32 << 20, 3 * stream_bytes + weight_bytes + (4 << 20))))

    return pl.pallas_call(
        write_unit_kernel,
        out_shape=jax.ShapeDtypeStruct((B, D), jnp.float32),
        grid=(nb,),
        in_specs=in_specs,
        out_specs=pl.BlockSpec((B_TILE, D), lambda i: (i, 0)),
        compiler_params=pltpu.CompilerParams(
            dimension_semantics=("parallel",),
            vmem_limit_bytes=vmem_limit),
    )(mem_bf, ctrl_bf, retr_bf, w_stack, b_comb,
      params["w_attn"], params["w_ctrl"], params["b_ctrl"])


# ----------------------------------------------------------------------------
# Pure-JAX reference (mirrors the PyTorch forward exactly, full f32)
# ----------------------------------------------------------------------------
def write_unit_ref(memories, retrieved, controls, p):
    prev_mem = memories[-1]
    concat = jnp.concatenate([retrieved, prev_mem], axis=1) @ p["w_cat"] + p["b_cat"]

    ctrl_prev = controls[:-1]
    last_c = controls[-1]
    attn_in = last_c[None] * ctrl_prev                               # [T, B, D]
    logits = jnp.einsum("tbd,d->tb", attn_in, p["w_attn"][0]) + p["b_attn"][0, 0]
    pw = jax.nn.softmax(logits, axis=0)                              # [T, B]
    attn_mem = jnp.einsum("tb,tbd->bd", pw, memories)
    next_mem = attn_mem @ p["w_mem"] + p["b_mem"] + concat

    gate = jax.nn.sigmoid(last_c @ p["w_ctrl"].T + p["b_ctrl"][0, 0])  # [B, 1]
    return gate * prev_mem + (1.0 - gate) * next_mem


# ----------------------------------------------------------------------------
# Deterministic parameter init (xavier_uniform weights, zero biases like the
# PyTorch module; the test overrides biases with small random values so the
# bias paths are actually exercised).
# ----------------------------------------------------------------------------
def xavier_uniform(key, fan_in, fan_out, shape):
    bound = float(np.sqrt(6.0 / (fan_in + fan_out)))
    return jax.random.uniform(key, shape, jnp.float32, -bound, bound)


def init_params(key, dim):
    k_cat, k_attn, k_mem, k_ctrl = jax.random.split(key, 4)
    return {
        # self.concat: Linear(2*dim, dim), stored transposed as [2D, D]
        "w_cat": xavier_uniform(k_cat, 2 * dim, dim, (2 * dim, dim)),
        "b_cat": jnp.zeros((1, dim), jnp.float32),
        # self.attn: Linear(dim, 1)   (torch weight shape (1, dim))
        "w_attn": xavier_uniform(k_attn, dim, 1, (1, dim)),
        "b_attn": jnp.zeros((1, 1), jnp.float32),
        # self.mem: Linear(dim, dim), stored as [in, out]
        "w_mem": xavier_uniform(k_mem, dim, dim, (dim, dim)),
        "b_mem": jnp.zeros((1, dim), jnp.float32),
        # self.control: Linear(dim, 1)
        "w_ctrl": xavier_uniform(k_ctrl, dim, 1, (1, dim)),
        "b_ctrl": jnp.zeros((1, 1), jnp.float32),
    }


# ----------------------------------------------------------------------------
if __name__ == "__main__":
    # B a multiple of the batch tile so the parallel grid has several steps
    # (DMA pipelining, v7x dual-TC sharding); D=128 keeps lanes dense.
    B, D, T = 256, 128, 4

    key = jax.random.PRNGKey(0)
    k_par, k_bias, k_mem, k_ctrl, k_retr = jax.random.split(key, 5)

    params = init_params(k_par, D)
    # Randomize the (normally zero-init) biases so the bias handling is tested.
    kb1, kb2, kb3, kb4 = jax.random.split(k_bias, 4)
    params["b_cat"] = 0.1 * jax.random.normal(kb1, (1, D), jnp.float32)
    params["b_mem"] = 0.1 * jax.random.normal(kb2, (1, D), jnp.float32)
    params["b_ctrl"] = 0.1 * jax.random.normal(kb3, (1, 1), jnp.float32)
    params["b_attn"] = 0.1 * jax.random.normal(kb4, (1, 1), jnp.float32)

    memories = jax.random.normal(k_mem, (T, B, D), jnp.float32)        # memories list
    controls = jax.random.normal(k_ctrl, (T + 1, B, D), jnp.float32)   # controls list
    retrieved = jax.random.normal(k_retr, (B, D), jnp.float32)

    out = write_unit(memories, retrieved, controls, params)
    jax.block_until_ready(out)

    ref = write_unit_ref(memories, retrieved, controls, params)
    # Intentional precision trade (kernel is HBM-bandwidth bound): bf16 input
    # streams + bf16 MXU matmul (f32 accumulation) + approx softmax reciprocal
    # -> compare loosely against the full-f32 reference.
    np.testing.assert_allclose(np.asarray(out), np.asarray(ref),
                               rtol=4e-2, atol=4e-2)

    print("KERNEL_OK")
</pallas_src>

<mosaic_0001>
module attributes {stable_mosaic.version = 11 : i64} {
  func.func @write_unit_kernel(%arg0: i32, %arg1: memref<4x64x128xbf16, #tpu.memory_space<vmem>>, %arg2: memref<5x64x128xbf16, #tpu.memory_space<vmem>>, %arg3: memref<64x128xbf16, #tpu.memory_space<vmem>>, %arg4: memref<384x128xbf16, #tpu.memory_space<vmem>>, %arg5: memref<1x128xf32, #tpu.memory_space<vmem>>, %arg6: memref<1x128xf32, #tpu.memory_space<vmem>>, %arg7: memref<1x128xf32, #tpu.memory_space<vmem>>, %arg8: memref<1x1xf32, #tpu.memory_space<smem>>, %arg9: memref<64x128xf32, #tpu.memory_space<vmem>>) attributes {dimension_semantics = [#tpu.dimension_semantics<parallel>], iteration_bounds = array<i64: 4>, scalar_prefetch = 0 : i64, scratch_operands = 0 : i64, tpu.core_type = #tpu.core_type<tc>, window_params = [{transform_indices = @transform_0, window_bounds = array<i64: 4, 64, 128>}, {transform_indices = @transform_1, window_bounds = array<i64: 5, 64, 128>}, {transform_indices = @transform_2, window_bounds = array<i64: 64, 128>}, {pipeline_mode = #tpu.pipeline_mode<synchronous>, transform_indices = @transform_3, window_bounds = array<i64: 384, 128>}, {pipeline_mode = #tpu.pipeline_mode<synchronous>, transform_indices = @transform_4, window_bounds = array<i64: 1, 128>}, {pipeline_mode = #tpu.pipeline_mode<synchronous>, transform_indices = @transform_5, window_bounds = array<i64: 1, 128>}, {pipeline_mode = #tpu.pipeline_mode<synchronous>, transform_indices = @transform_6, window_bounds = array<i64: 1, 128>}, {transform_indices = @transform_7, window_bounds = array<i64: 1, 1>}, {transform_indices = @transform_8, window_bounds = array<i64: 64, 128>}]} {
    %c3 = arith.constant 3 : index
    %c0 = arith.constant 0 : index
    %c0_0 = arith.constant 0 : index
    %0 = vector.load %arg1[%c3, %c0, %c0_0] : memref<4x64x128xbf16, #tpu.memory_space<vmem>>, vector<1x64x128xbf16>
    %1 = vector.shape_cast %0 : vector<1x64x128xbf16> to vector<64x128xbf16>
    %2 = arith.extf %1 : vector<64x128xbf16> to vector<64x128xf32>
    %c4 = arith.constant 4 : index
    %c0_1 = arith.constant 0 : index
    %c0_2 = arith.constant 0 : index
    %3 = vector.load %arg2[%c4, %c0_1, %c0_2] : memref<5x64x128xbf16, #tpu.memory_space<vmem>>, vector<1x64x128xbf16>
    %4 = vector.shape_cast %3 : vector<1x64x128xbf16> to vector<64x128xbf16>
    %5 = arith.extf %4 : vector<64x128xbf16> to vector<64x128xf32>
    %c0_3 = arith.constant 0 : index
    %c0_4 = arith.constant 0 : index
    %6 = vector.load %arg6[%c0_3, %c0_4] : memref<1x128xf32, #tpu.memory_space<vmem>>, vector<1x128xf32>
    %7 = vector.broadcast %6 : vector<1x128xf32> to vector<64x128xf32>
    %8 = arith.mulf %5, %7 : vector<64x128xf32>
    %cst = arith.constant 0xFF800000 : f32
    %9 = vector.broadcast %cst : f32 to vector<64x1xf32>
    %cst_5 = arith.constant 0.000000e+00 : f32
    %10 = vector.broadcast %cst_5 : f32 to vector<64x1xf32>
    %cst_6 = arith.constant 0.000000e+00 : f32
    %11 = vector.broadcast %cst_6 : f32 to vector<64x128xf32>
    %c0_i32 = arith.constant 0 : i32
    %12 = arith.index_cast %c0_i32 : i32 to index
    %c0_7 = arith.constant 0 : index
    %c0_8 = arith.constant 0 : index
    %13 = vector.load %arg2[%12, %c0_7, %c0_8] : memref<5x64x128xbf16, #tpu.memory_space<vmem>>, vector<1x64x128xbf16>
    %14 = vector.shape_cast %13 : vector<1x64x128xbf16> to vector<64x128xbf16>
    %15 = arith.extf %14 : vector<64x128xbf16> to vector<64x128xf32>
    %16 = arith.mulf %15, %8 : vector<64x128xf32>
    %cst_9 = arith.constant dense<0.000000e+00> : vector<64xf32>
    %17 = vector.multi_reduction <add>, %16, %cst_9 [1] : vector<64x128xf32> to vector<64xf32>
    %18 = vector.shape_cast %17 : vector<64xf32> to vector<64x1xf32>
    %19 = arith.maximumf %9, %18 : vector<64x1xf32>
    %20 = arith.subf %9, %19 : vector<64x1xf32>
    %21 = math.exp %20 : vector<64x1xf32>
    %22 = arith.subf %18, %19 : vector<64x1xf32>
    %23 = math.exp %22 : vector<64x1xf32>
    %24 = arith.mulf %21, %10 : vector<64x1xf32>
    %25 = arith.addf %24, %23 : vector<64x1xf32>
    %26 = vector.broadcast %21 : vector<64x1xf32> to vector<64x128xf32>
    %27 = arith.mulf %26, %11 : vector<64x128xf32>
    %28 = arith.index_cast %c0_i32 : i32 to index
    %c0_10 = arith.constant 0 : index
    %c0_11 = arith.constant 0 : index
    %29 = vector.load %arg1[%28, %c0_10, %c0_11] : memref<4x64x128xbf16, #tpu.memory_space<vmem>>, vector<1x64x128xbf16>
    %30 = vector.shape_cast %29 : vector<1x64x128xbf16> to vector<64x128xbf16>
    %31 = arith.extf %30 : vector<64x128xbf16> to vector<64x128xf32>
    %32 = vector.broadcast %23 : vector<64x1xf32> to vector<64x128xf32>
    %33 = arith.mulf %32, %31 : vector<64x128xf32>
    %34 = arith.addf %27, %33 : vector<64x128xf32>
    %c1_i32 = arith.constant 1 : i32
    %35 = arith.index_cast %c1_i32 : i32 to index
    %c0_12 = arith.constant 0 : index
    %c0_13 = arith.constant 0 : index
    %36 = vector.load %arg2[%35, %c0_12, %c0_13] : memref<5x64x128xbf16, #tpu.memory_space<vmem>>, vector<1x64x128xbf16>
    %37 = vector.shape_cast %36 : vector<1x64x128xbf16> to vector<64x128xbf16>
    %38 = arith.extf %37 : vector<64x128xbf16> to vector<64x128xf32>
    %39 = arith.mulf %38, %8 : vector<64x128xf32>
    %cst_14 = arith.constant dense<0.000000e+00> : vector<64xf32>
    %40 = vector.multi_reduction <add>, %39, %cst_14 [1] : vector<64x128xf32> to vector<64xf32>
    %41 = vector.shape_cast %40 : vector<64xf32> to vector<64x1xf32>
    %42 = arith.maximumf %19, %41 : vector<64x1xf32>
    %43 = arith.subf %19, %42 : vector<64x1xf32>
    %44 = math.exp %43 : vector<64x1xf32>
    %45 = arith.subf %41, %42 : vector<64x1xf32>
    %46 = math.exp %45 : vector<64x1xf32>
    %47 = arith.mulf %44, %25 : vector<64x1xf32>
    %48 = arith.addf %47, %46 : vector<64x1xf32>
    %49 = vector.broadcast %44 : vector<64x1xf32> to vector<64x128xf32>
    %50 = arith.mulf %49, %34 : vector<64x128xf32>
    %51 = arith.index_cast %c1_i32 : i32 to index
    %c0_15 = arith.constant 0 : index
    %c0_16 = arith.constant 0 : index
    %52 = vector.load %arg1[%51, %c0_15, %c0_16] : memref<4x64x128xbf16, #tpu.memory_space<vmem>>, vector<1x64x128xbf16>
    %53 = vector.shape_cast %52 : vector<1x64x128xbf16> to vector<64x128xbf16>
    %54 = arith.extf %53 : vector<64x128xbf16> to vector<64x128xf32>
    %55 = vector.broadcast %46 : vector<64x1xf32> to vector<64x128xf32>
    %56 = arith.mulf %55, %54 : vector<64x128xf32>
    %57 = arith.addf %50, %56 : vector<64x128xf32>
    %c2_i32 = arith.constant 2 : i32
    %58 = arith.index_cast %c2_i32 : i32 to index
    %c0_17 = arith.constant 0 : index
    %c0_18 = arith.constant 0 : index
    %59 = vector.load %arg2[%58, %c0_17, %c0_18] : memref<5x64x128xbf16, #tpu.memory_space<vmem>>, vector<1x64x128xbf16>
    %60 = vector.shape_cast %59 : vector<1x64x128xbf16> to vector<64x128xbf16>
    %61 = arith.extf %60 : vector<64x128xbf16> to vector<64x128xf32>
    %62 = arith.mulf %61, %8 : vector<64x128xf32>
    %cst_19 = arith.constant dense<0.000000e+00> : vector<64xf32>
    %63 = vector.multi_reduction <add>, %62, %cst_19 [1] : vector<64x128xf32> to vector<64xf32>
    %64 = vector.shape_cast %63 : vector<64xf32> to vector<64x1xf32>
    %65 = arith.maximumf %42, %64 : vector<64x1xf32>
    %66 = arith.subf %42, %65 : vector<64x1xf32>
    %67 = math.exp %66 : vector<64x1xf32>
    %68 = arith.subf %64, %65 : vector<64x1xf32>
    %69 = math.exp %68 : vector<64x1xf32>
    %70 = arith.mulf %67, %48 : vector<64x1xf32>
    %71 = arith.addf %70, %69 : vector<64x1xf32>
    %72 = vector.broadcast %67 : vector<64x1xf32> to vector<64x128xf32>
    %73 = arith.mulf %72, %57 : vector<64x128xf32>
    %74 = arith.index_cast %c2_i32 : i32 to index
    %c0_20 = arith.constant 0 : index
    %c0_21 = arith.constant 0 : index
    %75 = vector.load %arg1[%74, %c0_20, %c0_21] : memref<4x64x128xbf16, #tpu.memory_space<vmem>>, vector<1x64x128xbf16>
    %76 = vector.shape_cast %75 : vector<1x64x128xbf16> to vector<64x128xbf16>
    %77 = arith.extf %76 : vector<64x128xbf16> to vector<64x128xf32>
    %78 = vector.broadcast %69 : vector<64x1xf32> to vector<64x128xf32>
    %79 = arith.mulf %78, %77 : vector<64x128xf32>
    %80 = arith.addf %73, %79 : vector<64x128xf32>
    %c3_i32 = arith.constant 3 : i32
    %81 = arith.index_cast %c3_i32 : i32 to index
    %c0_22 = arith.constant 0 : index
    %c0_23 = arith.constant 0 : index
    %82 = vector.load %arg2[%81, %c0_22, %c0_23] : memref<5x64x128xbf16, #tpu.memory_space<vmem>>, vector<1x64x128xbf16>
    %83 = vector.shape_cast %82 : vector<1x64x128xbf16> to vector<64x128xbf16>
    %84 = arith.extf %83 : vector<64x128xbf16> to vector<64x128xf32>
    %85 = arith.mulf %84, %8 : vector<64x128xf32>
    %cst_24 = arith.constant dense<0.000000e+00> : vector<64xf32>
    %86 = vector.multi_reduction <add>, %85, %cst_24 [1] : vector<64x128xf32> to vector<64xf32>
    %87 = vector.shape_cast %86 : vector<64xf32> to vector<64x1xf32>
    %88 = arith.maximumf %65, %87 : vector<64x1xf32>
    %89 = arith.subf %65, %88 : vector<64x1xf32>
    %90 = math.exp %89 : vector<64x1xf32>
    %91 = arith.subf %87, %88 : vector<64x1xf32>
    %92 = math.exp %91 : vector<64x1xf32>
    %93 = arith.mulf %90, %71 : vector<64x1xf32>
    %94 = arith.addf %93, %92 : vector<64x1xf32>
    %95 = vector.broadcast %90 : vector<64x1xf32> to vector<64x128xf32>
    %96 = arith.mulf %95, %80 : vector<64x128xf32>
    %97 = arith.index_cast %c3_i32 : i32 to index
    %c0_25 = arith.constant 0 : index
    %c0_26 = arith.constant 0 : index
    %98 = vector.load %arg1[%97, %c0_25, %c0_26] : memref<4x64x128xbf16, #tpu.memory_space<vmem>>, vector<1x64x128xbf16>
    %99 = vector.shape_cast %98 : vector<1x64x128xbf16> to vector<64x128xbf16>
    %100 = arith.extf %99 : vector<64x128xbf16> to vector<64x128xf32>
    %101 = vector.broadcast %92 : vector<64x1xf32> to vector<64x128xf32>
    %102 = arith.mulf %101, %100 : vector<64x128xf32>
    %103 = arith.addf %96, %102 : vector<64x128xf32>
    %c4_i32 = arith.constant 4 : i32
    %104 = tpu.reciprocal %94 {approx = true} : vector<64x1xf32> -> vector<64x1xf32>
    %105 = vector.broadcast %104 : vector<64x1xf32> to vector<64x128xf32>
    %106 = arith.mulf %103, %105 : vector<64x128xf32>
    %c0_27 = arith.constant 0 : index
    %c0_28 = arith.constant 0 : index
    %107 = vector.load %arg3[%c0_27, %c0_28] : memref<64x128xbf16, #tpu.memory_space<vmem>>, vector<64x128xbf16>
    %108 = arith.truncf %106 : vector<64x128xf32> to vector<64x128xbf16>
    %109 = tpu.concatenate %107, %1, %108 in 1 : vector<64x128xbf16>, vector<64x128xbf16>, vector<64x128xbf16> -> vector<64x384xbf16>
    %c0_29 = arith.constant 0 : index
    %c0_30 = arith.constant 0 : index
    %110 = vector.load %arg4[%c0_29, %c0_30] : memref<384x128xbf16, #tpu.memory_space<vmem>>, vector<384x128xbf16>
    %cst_31 = arith.constant dense<0.000000e+00> : vector<64x128xf32>
    %111 = tpu.matmul %109, %110, %cst_31 {dimension_numbers = #tpu.dot_dimension_numbers<[1], [0], [0], [1], [0, 0, 1, 1], [], []>} : vector<64x384xbf16>, vector<384x128xbf16>, vector<64x128xf32> -> vector<64x128xf32>
    %c0_32 = arith.constant 0 : index
    %c0_33 = arith.constant 0 : index
    %112 = vector.load %arg5[%c0_32, %c0_33] : memref<1x128xf32, #tpu.memory_space<vmem>>, vector<1x128xf32>
    %113 = vector.broadcast %112 : vector<1x128xf32> to vector<64x128xf32>
    %114 = arith.addf %111, %113 : vector<64x128xf32>
    %c0_34 = arith.constant 0 : index
    %c0_35 = arith.constant 0 : index
    %115 = vector.load %arg7[%c0_34, %c0_35] : memref<1x128xf32, #tpu.memory_space<vmem>>, vector<1x128xf32>
    %116 = vector.broadcast %115 : vector<1x128xf32> to vector<64x128xf32>
    %117 = arith.mulf %5, %116 : vector<64x128xf32>
    %cst_36 = arith.constant dense<0.000000e+00> : vector<64xf32>
    %118 = vector.multi_reduction <add>, %117, %cst_36 [1] : vector<64x128xf32> to vector<64xf32>
    %119 = vector.shape_cast %118 : vector<64xf32> to vector<64x1xf32>
    %c0_37 = arith.constant 0 : index
    %c0_38 = arith.constant 0 : index
    %120 = memref.load %arg8[%c0_37, %c0_38] : memref<1x1xf32, #tpu.memory_space<smem>>
    %121 = vector.broadcast %120 : f32 to vector<64x1xf32>
    %122 = arith.addf %119, %121 : vector<64x1xf32>
    %123 = arith.negf %122 : vector<64x1xf32>
    %124 = math.exp %123 : vector<64x1xf32>
    %cst_39 = arith.constant 1.000000e+00 : f32
    %125 = vector.broadcast %cst_39 : f32 to vector<64x1xf32>
    %126 = arith.addf %125, %124 : vector<64x1xf32>
    %127 = arith.divf %125, %126 : vector<64x1xf32>
    %128 = arith.subf %2, %114 : vector<64x128xf32>
    %129 = vector.broadcast %127 : vector<64x1xf32> to vector<64x128xf32>
    %130 = arith.mulf %129, %128 : vector<64x128xf32>
    %131 = arith.addf %114, %130 : vector<64x128xf32>
    %c0_40 = arith.constant 0 : index
    %c0_41 = arith.constant 0 : index
    %132 = vector.load %arg9[%c0_40, %c0_41] : memref<64x128xf32, #tpu.memory_space<vmem>>, vector<64x128xf32>
    tpu.vector_store %arg9[%c0_40, %c0_41], %131 {strides = array<i32>} : memref<64x128xf32, #tpu.memory_space<vmem>>, vector<64x128xf32>,
    return
  }
  func.func @transform_0(%arg0: i32) -> (i32, i32, i32) {
    %c0_i32 = arith.constant 0 : i32
    %c0_i32_0 = arith.constant 0 : i32
    %c0_i32_1 = arith.constant 0 : i32
    return %c0_i32, %arg0, %c0_i32_0 : i32, i32, i32
  }
  func.func @transform_1(%arg0: i32) -> (i32, i32, i32) {
    %c0_i32 = arith.constant 0 : i32
    %c0_i32_0 = arith.constant 0 : i32
    %c0_i32_1 = arith.constant 0 : i32
    return %c0_i32, %arg0, %c0_i32_0 : i32, i32, i32
  }
  func.func @transform_2(%arg0: i32) -> (i32, i32) {
    %c0_i32 = arith.constant 0 : i32
    %c0_i32_0 = arith.constant 0 : i32
    return %arg0, %c0_i32 : i32, i32
  }
  func.func @transform_3(%arg0: i32) -> (i32, i32) {
    %c0_i32 = arith.constant 0 : i32
    %c0_i32_0 = arith.constant 0 : i32
    %c0_i32_1 = arith.constant 0 : i32
    return %c0_i32, %c0_i32_0 : i32, i32
  }
  func.func @transform_4(%arg0: i32) -> (i32, i32) {
    %c0_i32 = arith.constant 0 : i32
    %c0_i32_0 = arith.constant 0 : i32
    %c0_i32_1 = arith.constant 0 : i32
    return %c0_i32, %c0_i32_0 : i32, i32
  }
  func.func @transform_5(%arg0: i32) -> (i32, i32) {
    %c0_i32 = arith.constant 0 : i32
    %c0_i32_0 = arith.constant 0 : i32
    %c0_i32_1 = arith.constant 0 : i32
    return %c0_i32, %c0_i32_0 : i32, i32
  }
  func.func @transform_6(%arg0: i32) -> (i32, i32) {
    %c0_i32 = arith.constant 0 : i32
    %c0_i32_0 = arith.constant 0 : i32
    %c0_i32_1 = arith.constant 0 : i32
    return %c0_i32, %c0_i32_0 : i32, i32
  }
  func.func @transform_7(%arg0: i32) -> (i32, i32) {
    %c0_i32 = arith.constant 0 : i32
    %c0_i32_0 = arith.constant 0 : i32
    %c0_i32_1 = arith.constant 0 : i32
    return %c0_i32, %c0_i32_0 : i32, i32
  }
  func.func @transform_8(%arg0: i32) -> (i32, i32) {
    %c0_i32 = arith.constant 0 : i32
    %c0_i32_0 = arith.constant 0 : i32
    return %arg0, %c0_i32 : i32, i32
  }
}

</mosaic_0001>

<bundles_post_ra>
// kernel: write_unit.1
= control target key start
LH: loop header
LB: loop body
LE: loop exit
PB: predicated region body
PF: predicated region fallthrough
CT: control target
= control target key end

     0   :  { %s3659_s0 = inlined_call_operand.vmem [shape: bf16[4,256,128], index: 0, kind: input, shape index: {}]   ;;  %s3660_s1 = inlined_call_operand.vmem [shape: bf16[5,256,128], index: 1, kind: input, shape index: {}]   ;;  %s3661_s2 = inlined_call_operand.vmem [shape: bf16[256,128], index: 2, kind: input, shape index: {}]   ;;  %s3662_s3 = inlined_call_operand.vmem [shape: bf16[384,128], index: 3, kind: input, shape index: {}]   ;;  %s3663_s4 = inlined_call_operand.vmem [shape: f32[1,128], index: 4, kind: input, shape index: {}]   ;;  %s3664_s5 = inlined_call_operand.vmem [shape: f32[1,128], index: 5, kind: input, shape index: {}]   ;;  %s3665_s6 = inlined_call_operand.vmem [shape: f32[1,128], index: 6, kind: input, shape index: {}]   ;;  %s3666_s7 = inlined_call_operand.<no memory space> [shape: f32[1,1], index: 7, kind: input, shape index: {}]   ;;  %s3667_s8 = inlined_call_operand.hbm [shape: f32[256,128], index: 8, kind: output, shape index: {}]  }
   0x1   :  { %13 = sst [smem:[#allocation2]] %s3666_s7 }
   0x2   :  { %14 = vsyncpa [#allocation6], 0 }
   0x3   :  { %16 = vsyncpa [#allocation6 + $0x1], 0  ;;  %s2708_s29 = smov 0   ;;  %s2710_s30 = smov 0  }
   0x4   :  { %s2712_s9 = smov 0   ;;  %s2714_s10 = smov 0  }
   0x5 LB: > { %s2729_s7 = sadd.s32 4294967295, %s2655_s10   ;;  %s1983_s11 = sadd.s32 4294967294, %s2655_s10   ;;  %s2655_s10 = sphi %s2714_s10, %s3725_s10   ;;  %s2651_s9 = sphi %s2712_s9, %s3724_s9   ;;  %s2647_s30 = sphi %s2710_s30, %s3723_s30   ;;  %s2643_s29 = sphi %s2708_s29, %s3722_s29  }
   0x6   : > { %s2733_s12 = sadd.s32 1, %s2655_s10   ;;  %s29_s13 = sadd.s32 1, %s2651_s9 }
   0x7   : > { %s26_s14 = ssub.s32 %s2655_s10, %s2733_s12  ;;  %p36_p0 = scmp.ne.s32.totalorder %s2651_s9, %s2647_s30 }
   0x8   : > { %p27_p1 = scmp.eq.s32.totalorder %s26_s14, 0  ;;  %p37_p2 = scmp.eq.s32.totalorder %s2655_s10, 0 }
   0x9   : > { %p223_p3 = scmp.eq.s32.totalorder %s2729_s7, 3  ;;  %p228_p4 = scmp.ne.s32.totalorder %s2647_s30, %s2643_s29 }
   0xa   : > { %s2745_s15 = scalar_select %p27_p1, %s2651_s9, %s29_s13  }
   0xb   : > { %p2747_p5 = por %p37_p2, %p36_p0  ;;  %p2751_p6 = por %p223_p3, %p36_p0 }
   0xc   : > { %p229_p7 = scmp.eq.s32.totalorder %s1983_s11, 3  ;;  %p1985_p9 = scmp.ge.s32.totalorder %s2655_s10, 4 }
   0xe   : > { %p2755_p8 = por %p229_p7, %p228_p4  ;;  %260 = sbr.rel (%p1985_p9) target bundleno = 48 (0x30), region = 36 }
  0x15   : > { %263 = sbr.rel (!%p2747_p5) target bundleno = 33 (0x21), region = 40  ;;  %s265_s19 = sand.u32 (%p2747_p5), 1, %s2651_s9  }
  0x16   : > { %s2100_s20 = sshll.u32 (%p2747_p5), %s2655_s10, 5  ;;  %s1986_s21 = sshll.u32 (%p2747_p5), %s265_s19, 7 }
  0x17   : > { %s2767_s24 = scalar_lea.vmem (%p2747_p5), %s3659_s0, %s2100_s20  ;;  %s267_s25 = scalar_lea.vmem (%p2747_p5), [#allocation3], %s1986_s21 }
  0x18   : > { %v286_v0 = vld [vmem:[%s2767_s24] sm:$0xff] (%p2747_p5)   ;;  %v290_v1 = vld [vmem:[%s2767_s24 + $0x8] sm:$0xff] (%p2747_p5)   ;;  %v294_v2 = vld [vmem:[%s2767_s24 + $0x10] sm:$0xff] (%p2747_p5)  }
  0x19   : > { %287 = vst [vmem:[%s267_s25] sm:$0xff] (%p2747_p5), %v286_v0   ;;  %291 = vst [vmem:[%s267_s25 + $0x8] sm:$0xff] (%p2747_p5), %v290_v1   ;;  %v298_v3 = vld [vmem:[%s2767_s24 + $0x18] sm:$0xff] (%p2747_p5)   ;;  %v302_v4 = vld [vmem:[%s2767_s24 + $0x80] sm:$0xff] (%p2747_p5)  }
  0x1a   : > { %295 = vst [vmem:[%s267_s25 + $0x10] sm:$0xff] (%p2747_p5), %v294_v2   ;;  %v306_v5 = vld [vmem:[%s2767_s24 + $0x88] sm:$0xff] (%p2747_p5)   ;;  %299 = vst [vmem:[%s267_s25 + $0x18] sm:$0xff] (%p2747_p5), %v298_v3   ;;  %v310_v6 = vld [vmem:[%s2767_s24 + $0x90] sm:$0xff] (%p2747_p5)  }
  0x1b   : > { %303 = vst [vmem:[%s267_s25 + $0x20] sm:$0xff] (%p2747_p5), %v302_v4   ;;  %307 = vst [vmem:[%s267_s25 + $0x28] sm:$0xff] (%p2747_p5), %v306_v5   ;;  %v314_v7 = vld [vmem:[%s2767_s24 + $0x98] sm:$0xff] (%p2747_p5)   ;;  %v318_v8 = vld [vmem:[%s2767_s24 + $0x100] sm:$0xff] (%p2747_p5)  }
  0x1c   : > { %311 = vst [vmem:[%s267_s25 + $0x30] sm:$0xff] %v310_v6   ;;  %315 = vst [vmem:[%s267_s25 + $0x38] sm:$0xff] %v314_v7   ;;  %v322_v9 = vld [vmem:[%s2767_s24 + $0x108] sm:$0xff]   ;;  %v326_v10 = vld [vmem:[%s2767_s24 + $0x110] sm:$0xff]  }
  0x1d   : > { %319 = vst [vmem:[%s267_s25 + $0x40] sm:$0xff] %v318_v8   ;;  %v330_v11 = vld [vmem:[%s2767_s24 + $0x118] sm:$0xff]   ;;  %323 = vst [vmem:[%s267_s25 + $0x48] sm:$0xff] %v322_v9   ;;  %v334_v12 = vld [vmem:[%s2767_s24 + $0x180] sm:$0xff]  }
  0x1e   : > { %327 = vst [vmem:[%s267_s25 + $0x50] sm:$0xff] %v326_v10   ;;  %331 = vst [vmem:[%s267_s25 + $0x58] sm:$0xff] %v330_v11   ;;  %v338_v13 = vld [vmem:[%s2767_s24 + $0x188] sm:$0xff]   ;;  %v342_v14 = vld [vmem:[%s2767_s24 + $0x190] sm:$0xff]  }
  0x1f   : > { %335 = vst [vmem:[%s267_s25 + $0x60] sm:$0xff] %v334_v12   ;;  %339 = vst [vmem:[%s267_s25 + $0x68] sm:$0xff] %v338_v13   ;;  %v346_v15 = vld [vmem:[%s2767_s24 + $0x198] sm:$0xff]  }
  0x20   : > { %343 = vst [vmem:[%s267_s25 + $0x70] sm:$0xff] %v342_v14   ;;  %347 = vst [vmem:[%s267_s25 + $0x78] sm:$0xff] %v346_v15  }
  0x21 PF: > { %436 = sbr.rel (!%p2747_p5) target bundleno = 48 (0x30), region = 81  ;;  %s438_s26 = sand.u32 (%p2747_p5), 1, %s2651_s9  }
  0x22   : > { %s2101_s27 = sshll.u32 (%p2747_p5), %s2655_s10, 5  ;;  %s2337_s28 = smul.u32 (%p2747_p5), 160, %s438_s26 }
  0x23   : > { %s2792_s14 = scalar_lea.vmem (%p2747_p5), %s3660_s1, %s2101_s27 }
  0x24   : > { %v459_v16 = vld [vmem:[%s2792_s14] sm:$0xff] (%p2747_p5)   ;;  %v463_v17 = vld [vmem:[%s2792_s14 + $0x8] sm:$0xff] (%p2747_p5)   ;;  %v467_v18 = vld [vmem:[%s2792_s14 + $0x10] sm:$0xff] (%p2747_p5)   ;;  %s2800_s16 = scalar_lea.vmem (%p2747_p5), [#allocation4], %s2337_s28 }
  0x25   : > { %v471_v19 = vld [vmem:[%s2792_s14 + $0x18] sm:$0xff] (%p2747_p5)   ;;  %v475_v20 = vld [vmem:[%s2792_s14 + $0x80] sm:$0xff] (%p2747_p5)   ;;  %v479_v21 = vld [vmem:[%s2792_s14 + $0x88] sm:$0xff] (%p2747_p5)   ;;  %460 = vst [vmem:[%s2800_s16] sm:$0xff] (%p2747_p5), %v459_v16  }
  0x26   : > { %464 = vst [vmem:[%s2800_s16 + $0x8] sm:$0xff] (%p2747_p5), %v463_v17   ;;  %468 = vst [vmem:[%s2800_s16 + $0x10] sm:$0xff] (%p2747_p5), %v467_v18   ;;  %v483_v22 = vld [vmem:[%s2792_s14 + $0x90] sm:$0xff] (%p2747_p5)   ;;  %v487_v23 = vld [vmem:[%s2792_s14 + $0x98] sm:$0xff] (%p2747_p5)  }
  0x27   : > { %472 = vst [vmem:[%s2800_s16 + $0x18] sm:$0xff] (%p2747_p5), %v471_v19   ;;  %476 = vst [vmem:[%s2800_s16 + $0x20] sm:$0xff] (%p2747_p5), %v475_v20   ;;  %v491_v24 = vld [vmem:[%s2792_s14 + $0x100] sm:$0xff] (%p2747_p5)   ;;  %v495_v25 = vld [vmem:[%s2792_s14 + $0x108] sm:$0xff] (%p2747_p5)  }
  0x28   : > { %480 = vst [vmem:[%s2800_s16 + $0x28] sm:$0xff] %v479_v21   ;;  %484 = vst [vmem:[%s2800_s16 + $0x30] sm:$0xff] %v483_v22   ;;  %v499_v26 = vld [vmem:[%s2792_s14 + $0x110] sm:$0xff]   ;;  %v503_v27 = vld [vmem:[%s2792_s14 + $0x118] sm:$0xff]  }
  0x29   : > { %488 = vst [vmem:[%s2800_s16 + $0x38] sm:$0xff] %v487_v23   ;;  %492 = vst [vmem:[%s2800_s16 + $0x40] sm:$0xff] %v491_v24   ;;  %v507_v28 = vld [vmem:[%s2792_s14 + $0x180] sm:$0xff]   ;;  %v511_v29 = vld [vmem:[%s2792_s14 + $0x188] sm:$0xff]  }
  0x2a   : > { %496 = vst [vmem:[%s2800_s16 + $0x48] sm:$0xff] %v495_v25   ;;  %500 = vst [vmem:[%s2800_s16 + $0x50] sm:$0xff] %v499_v26   ;;  %v515_v30 = vld [vmem:[%s2792_s14 + $0x190] sm:$0xff]   ;;  %v519_v31 = vld [vmem:[%s2792_s14 + $0x198] sm:$0xff]  }
  0x2b   : > { %504 = vst [vmem:[%s2800_s16 + $0x58] sm:$0xff] %v503_v27   ;;  %508 = vst [vmem:[%s2800_s16 + $0x60] sm:$0xff] %v507_v28   ;;  %v523_v32 = vld [vmem:[%s2792_s14 + $0x200] sm:$0xff]   ;;  %v527_v33 = vld [vmem:[%s2792_s14 + $0x208] sm:$0xff]  }
  0x2c   : > { %512 = vst [vmem:[%s2800_s16 + $0x68] sm:$0xff] %v511_v29   ;;  %516 = vst [vmem:[%s2800_s16 + $0x70] sm:$0xff] %v515_v30   ;;  %v531_v34 = vld [vmem:[%s2792_s14 + $0x210] sm:$0xff]   ;;  %v535_v35 = vld [vmem:[%s2792_s14 + $0x218] sm:$0xff]  }
  0x2d   : > { %520 = vst [vmem:[%s2800_s16 + $0x78] sm:$0xff] %v519_v31   ;;  %524 = vst [vmem:[%s2800_s16 + $0x80] sm:$0xff] %v523_v32  }
  0x2e   : > { %528 = vst [vmem:[%s2800_s16 + $0x88] sm:$0xff] %v527_v33   ;;  %532 = vst [vmem:[%s2800_s16 + $0x90] sm:$0xff] %v531_v34  }
  0x2f   : > { %536 = vst [vmem:[%s2800_s16 + $0x98] sm:$0xff] %v535_v35  }
  0x30 PF: > { %p1991_p10 = scmp.ge.s32.totalorder %s2655_s10, 1  ;;  %p649_p11 = scmp.lt.s32.totalorder %s2655_s10, 5 }
  0x32   : > { %p650_p12 = pnand %p1991_p10, %p649_p11 }
  0x34   : > { %653 = sbr.rel (%p650_p12) target bundleno = 567 (0x237), region = 126 }
  0x3b   : > { %s2839_s19 = sand.u32 1, %s2647_s30   ;;  %v2845_v36 = vld [vmem:[%s3664_s5] ss:$0 sm:$0xff]  ;;  %s1994_s25 = sshll.u32 %s2729_s7, 3 }
  0x3c   : > { %s2338_s20 = smul.u32 160, %s2839_s19  ;;  %s1992_s26 = sshll.u32 %s2839_s19, 7 }
  0x3d   : > { %p708_p13 = scmp.lt.s32.totalorder %s1994_s25, 31  ;;  %s3013_s27 = scalar_lea.vmem [#allocation3], %s1992_s26 }
  0x3e   : > { %s2847_s23 = scalar_lea.vmem [#allocation4], %s2338_s20  ;;  %s1993_s16 = sshll.u32 %s2839_s19, 6 }
  0x3f   : > { %v2850_v37 = vld [vmem:[%s2847_s23 + $0x88] sm:$0xff]   ;;  %v2854_v39 = vld [vmem:[%s2847_s23 + $0x80] sm:$0xff]   ;;  %v2892_v4 = vld [vmem:[%s2847_s23 + $0x90] sm:$0xff]   ;;  %s3727_s25 = smov (!%p708_p13, %s1994_s25), 31  ;;  %s2102_s21 = sshll.u32 %s2729_s7, 10 }
  0x40   : > { %v2235_v38 = vld [vmem:[%s2847_s23 + $0x8] sm:$0xff]   ;;  %v2109_v40 = vunpack.c.l.bf16 %v2850_v37  ;;  %v2105_v42 = vunpack.c.l.bf16 %v2854_v39  ;;  %v2120_v43 = vld [vmem:[%s2847_s23] sm:$0xff]   ;;  %v2110_v44 = vunpack.c.h.bf16 %v2850_v37  ;;  %v2106_v47 = vunpack.c.h.bf16 %v2854_v39  ;;  %v2236_v8 = vld [vmem:[%s2847_s23 + $0x10] sm:$0xff]   ;;  %s1995_s28 = sshll.u32 %s3727_s25, 2  ;;  %s3611_s25 = scalar_lea.hbm %s3667_s8, %s2102_s21 }
  0x41   : > { %v2125_v41 = vunpack.c.l.bf16 %v2235_v38  ;;  %v2121_v45 = vunpack.c.l.bf16 %v2120_v43  ;;  %v2126_v46 = vunpack.c.h.bf16 %v2235_v38  ;;  %v2122_v51 = vunpack.c.h.bf16 %v2120_v43  ;;  %v2241_v53 = vld [vmem:[%s2847_s23 + $0x20] sm:$0xff]   ;;  %v2242_v56 = vld [vmem:[%s2847_s23 + $0x28] sm:$0xff]   ;;  %v2898_v9 = vld [vmem:[%s2847_s23 + $0x98] sm:$0xff]   ;;  %s3024_s20 = scalar_lea.vmem %s3661_s2, %s1995_s28  ;;  %s1872_s7 = scalar_lea.sflag [#allocation6], %s2839_s19 }
  0x42   : > { %v2864_v48 = vmul.f32 %v2109_v40, %v2845_v36  ;;  %v2869_v49 = vmul.f32 %v2105_v42, %v2845_v36  ;;  %v2874_v50 = vmul.f32 %v2110_v44, %v2845_v36  ;;  %v2879_v52 = vmul.f32 %v2106_v47, %v2845_v36  ;;  %v2249_v61 = vld [vmem:[%s2847_s23 + $0x40] sm:$0xff]   ;;  %v2250_v2 = vld [vmem:[%s2847_s23 + $0x48] sm:$0xff]   ;;  %v2237_v23 = vld [vmem:[%s2847_s23 + $0x18] sm:$0xff]   ;;  %s2657_s28 = smov [#allocation5]  }
  0x43   : > { %v2154_v59 = vunpack.c.h.bf16 %v2241_v53  ;;  %v2153_v60 = vunpack.c.l.bf16 %v2241_v53  ;;  %v2158_v0 = vunpack.c.h.bf16 %v2242_v56  ;;  %v2157_v1 = vunpack.c.l.bf16 %v2242_v56  ;;  %v2243_v31 = vld [vmem:[%s2847_s23 + $0x30] sm:$0xff]   ;;  %v2257_v38 = vld [vmem:[%s2847_s23 + $0x60] sm:$0xff]   ;;  %v2258_v56 = vld [vmem:[%s2847_s23 + $0x68] sm:$0xff]   ;;  %s2597_s11 = sshll.u32 %s2657_s28, 4  ;;  %s2598_s11 = int_to_ptr.vmem [resolvable:$false] %s2597_s11 }
  0x44   : > { %v782_v54 = vmul.f32 %v2125_v41, %v2864_v48  ;;  %v780_v55 = vmul.f32 %v2121_v45, %v2869_v49  ;;  %v783_v57 = vmul.f32 %v2126_v46, %v2874_v50  ;;  %v781_v58 = vmul.f32 %v2122_v51, %v2879_v52  ;;  %v2244_v46 = vld [vmem:[%s2847_s23 + $0x38] sm:$0xff]  }
  0x45   : > { %v918_v62 = vmul.f32 %v2154_v59, %v2879_v52  ;;  %v917_v63 = vmul.f32 %v2153_v60, %v2869_v49  ;;  %v2186_v3 = vunpack.c.h.bf16 %v2249_v61  ;;  %v920_v5 = vmul.f32 %v2158_v0, %v2874_v50  ;;  %v2252_v0 = vld [vmem:[%s2847_s23 + $0x58] sm:$0xff]  }
  0x46   : > { %792 = vadd.xlane.f32.xlu1 %v782_v54  ;;  %788 = vadd.xlane.f32.xlu0 %v780_v55  ;;  %v919_v6 = vmul.f32 %v2157_v1, %v2864_v48  ;;  %v2185_v7 = vunpack.c.l.bf16 %v2249_v61  ;;  %v2190_v11 = vunpack.c.h.bf16 %v2250_v2  ;;  %v2189_v13 = vunpack.c.l.bf16 %v2250_v2  ;;  %v2251_v61 = vld [vmem:[%s2847_s23 + $0x50] sm:$0xff]  }
  0x47   : > { %v1072_v10 = vmul.f32 %v2186_v3, %v2879_v52  ;;  %v2114_v14 = vunpack.c.h.bf16 %v2892_v4  ;;  %v2113_v15 = vunpack.c.l.bf16 %v2892_v4  ;;  %v2130_v17 = vunpack.c.h.bf16 %v2236_v8  ;;  %v3082_v4 = vld [vmem:[%s3013_s27 + $0x20] sm:$0xff]  }
  0x48   : > { %v1071_v12 = vmul.f32 %v2185_v7, %v2869_v49  ;;  %v1074_v16 = vmul.f32 %v2190_v11, %v2874_v50  ;;  %v2129_v18 = vunpack.c.l.bf16 %v2236_v8  ;;  %v2118_v19 = vunpack.c.h.bf16 %v2898_v9 }
  0x49   : > { %v1073_v20 = vmul.f32 %v2189_v13, %v2864_v48  ;;  %v2910_v21 = vmul.f32 %v2114_v14, %v2845_v36  ;;  %v2915_v22 = vmul.f32 %v2113_v15, %v2845_v36  ;;  %v2117_v24 = vunpack.c.l.bf16 %v2898_v9 }
  0x4a   : > { %794 = vadd.xlane.f32.xlu1 %v783_v57  ;;  %790 = vadd.xlane.f32.xlu0 %v781_v58  ;;  %v2922_v25 = vmul.f32 %v2118_v19, %v2845_v36  ;;  %v2134_v26 = vunpack.c.h.bf16 %v2237_v23  ;;  %v2133_v30 = vunpack.c.l.bf16 %v2237_v23  ;;  %v2162_v34 = vunpack.c.h.bf16 %v2243_v31  ;;  %v2381_v23 = vld [vmem:[%s3662_s3] sm:$0xff]  }
  0x4b   : > { %v785_v27 = vmul.f32 %v2130_v17, %v2910_v21  ;;  %v784_v28 = vmul.f32 %v2129_v18, %v2915_v22  ;;  %v762_v29 = vmul.f32 %v2117_v24, %v2845_v36  ;;  %v2161_v35 = vunpack.c.l.bf16 %v2243_v31  ;;  %v2390_v31 = vld [vmem:[%s3662_s3 + $0x20] sm:$0xff]  }
  0x4c   : > { %v787_v32 = vmul.f32 %v2134_v26, %v2922_v25  ;;  %v922_v41 = vmul.f32 %v2162_v34, %v2910_v21  ;;  %v2218_v45 = vunpack.c.h.bf16 %v2257_v38  ;;  %v2217_v36 = vunpack.c.l.bf16 %v2257_v38  ;;  %v2385_v26 = vld [vmem:[%s3662_s3 + $0x10] sm:$0xff]   ;;  %v2393_v34 = vld [vmem:[%s3662_s3 + $0x28] sm:$0xff]  }
  0x4d   : > { %v786_v33 = vmul.f32 %v2133_v30, %v762_v29  ;;  %v921_v43 = vmul.f32 %v2161_v35, %v2915_v22  ;;  %v2166_v54 = vunpack.c.h.bf16 %v2244_v46  ;;  %v2165_v55 = vunpack.c.l.bf16 %v2244_v46  ;;  %v2389_v30 = vld [vmem:[%s3662_s3 + $0x60] sm:$0xff]   ;;  %v2394_v35 = vld [vmem:[%s3662_s3 + $0x90] sm:$0xff]  }
  0x4e   : > { %927 = vadd.xlane.f32.xlu1 %v918_v62  ;;  %925 = vadd.xlane.f32.xlu0 %v917_v63  ;;  %v1226_v51 = vmul.f32 %v2218_v45, %v2879_v52  ;;  %v1225_v53 = vmul.f32 %v2217_v36, %v2869_v49  ;;  %v2222_v59 = vunpack.c.h.bf16 %v2258_v56  ;;  %v2221_v60 = vunpack.c.l.bf16 %v2258_v56  ;;  %v2395_v38 = vld [vmem:[%s3662_s3 + $0x70] sm:$0xff]   ;;  %v2398_v45 = vld [vmem:[%s3662_s3 + $0x78] sm:$0xff]   ;;  %v3016_v46 = vld [vmem:[%s3013_s27 + $0x60] sm:$0xff]  }
  0x4f   : > { %v924_v57 = vmul.f32 %v2166_v54, %v2922_v25  ;;  %v923_v58 = vmul.f32 %v2165_v55, %v762_v29  ;;  %v2194_v49 = vunpack.c.h.bf16 %v2251_v61  ;;  %v2193_v63 = vunpack.c.l.bf16 %v2251_v61  ;;  %v2399_v36 = vld [vmem:[%s3662_s3 + $0x38] sm:$0xff]   ;;  %1652 = vmatprep.mubr.bf16.mxu0 %v3016_v46  ;;  %v2403_v54 = vld [vmem:[%s3662_s3 + $0xa8] sm:$0xff]   ;;  %v2405_v56 = vld [vmem:[%s3662_s3 + $0xb0] sm:$0xff]  }
  0x50   : > { %v1228_v62 = vmul.f32 %v2222_v59, %v2874_v50  ;;  %v1227_v52 = vmul.f32 %v2221_v60, %v2864_v48  ;;  %v2198_v3 = vunpack.c.h.bf16 %v2252_v0  ;;  %v3032_v55 = vld [vmem:[%s3013_s27 + $0x68] sm:$0xff]   ;;  %v3043_v59 = vld [vmem:[%s3013_s27 + $0x70] sm:$0xff]   ;;  %v3048_v61 = vld [vmem:[%s3013_s27 + $0x78] sm:$0xff]  }
  0x51   : > { %v1076_v1 = vmul.f32 %v2194_v49, %v2910_v21  ;;  %v1075_v2 = vmul.f32 %v2193_v63, %v2915_v22  ;;  %3680 = vst [vmem:[#allocation8_spill] sm:$0xff] %v3043_v59  ;;  %v2409_v60 = vld [vmem:[%s3024_s20 + $0x10] sm:$0xff]   ;;  %3681 = vst [vmem:[#allocation9_spill] sm:$0xff] %v3048_v61 }
  0x52   : > { %931 = vadd.xlane.f32.xlu1 %v920_v5  ;;  %929 = vadd.xlane.f32.xlu0 %v919_v6  ;;  %v2197_v5 = vunpack.c.l.bf16 %v2252_v0  ;;  %v2259_v6 = vld [vmem:[%s2847_s23 + $0x70] sm:$0xff]   ;;  %v1078_v7 = vmul.f32 %v2198_v3, %v2922_v25 }
  0x53   : > { %v2226_v8 = vunpack.c.h.bf16 %v2259_v6  ;;  %v2225_v48 = vunpack.c.l.bf16 %v2259_v6 }
  0x54   : > { %v1077_v50 = vmul.f32 %v2197_v5, %v762_v29 }
  0x55   : > { %v1230_v11 = vmul.f32 %v2226_v8, %v2910_v21  ;;  %v2382_v21 = vld [vmem:[%s3662_s3 + $0x48] sm:$0xff]  }
  0x56   : > { %1081 = vadd.xlane.f32.xlu1 %v1072_v10  ;;  %1079 = vadd.xlane.f32.xlu0 %v1071_v12  ;;  %v2260_v10 = vld [vmem:[%s2847_s23 + $0x78] sm:$0xff]   ;;  %v1229_v12 = vmul.f32 %v2225_v48, %v2915_v22  ;;  %v2383_v22 = vld [vmem:[%s3662_s3 + $0x8] sm:$0xff]  }
  0x57   : > { %v2230_v13 = vunpack.c.h.bf16 %v2260_v10  ;;  %v3098_v8 = vld [vmem:[%s3013_s27 + $0x48] sm:$0xff]  }
  0x59   : > { %v1232_v17 = vmul.f32 %v2230_v13, %v2922_v25  ;;  %v2384_v25 = vld [vmem:[%s3662_s3 + $0x50] sm:$0xff]  }
  0x5a   : > { %1085 = vadd.xlane.f32.xlu1 %v1074_v16  ;;  %1083 = vadd.xlane.f32.xlu0 %v1073_v20  ;;  %v2229_v16 = vunpack.c.l.bf16 %v2260_v10  ;;  %v2380_v20 = vld [vmem:[%s3662_s3 + $0x40] sm:$0xff]  }
  0x5b   : > { %2261 = vmatprep.subr.bf16.mxu0 %v2380_v20 }
  0x5c   : > { %v1231_v18 = vmul.f32 %v2229_v16, %v762_v29  ;;  %2262 = vmatpush3.bf16.msra.mxu0 %v2381_v23  ;;  %v2388_v29 = vld [vmem:[%s3662_s3 + $0x80] sm:$0xff]  }
  0x5d   : > { %2263 = vmatprep.subr.bf16.mxu0 %v2382_v21  ;;  %2313 = vmatprep.subr.bf16.mxu1 %v2388_v29  ;;  %v3107_v21 = vld [vmem:[%s3013_s27 + $0x10] sm:$0xff]  }
  0x5e   : > { %798 = vadd.xlane.f32.xlu1 %v785_v27  ;;  %796 = vadd.xlane.f32.xlu0 %v784_v28  ;;  %v2386_v27 = vld [vmem:[%s3662_s3 + $0x58] sm:$0xff]  }
  0x5f   : > { %v2387_v28 = vld [vmem:[%s3662_s3 + $0x18] sm:$0xff]   ;;  %2314 = vmatpush3.bf16.msra.mxu1 %v2388_v29  ;;  %v2206_v29 = vunpack.c.h.bf16 %v3098_v8 }
  0x60   : > { %2264 = vmatpush3.bf16.msra.mxu0 %v2383_v22 }
  0x61   : > { %2265 = vmatprep.subr.bf16.mxu0 %v2384_v25 }
  0x62   : > { %802 = vadd.xlane.f32.xlu1 %v787_v32  ;;  %800 = vadd.xlane.f32.xlu0 %v786_v33  ;;  %v2391_v32 = vld [vmem:[%s3662_s3 + $0x88] sm:$0xff]  }
  0x63   : > { %v2392_v33 = vld [vmem:[%s3662_s3 + $0x68] sm:$0xff]   ;;  %2315 = vmatprep.subr.bf16.mxu1 %v2391_v32 }
  0x64   : > { %2266 = vmatpush3.bf16.msra.mxu0 %v2385_v26  ;;  %2316 = vmatpush3.bf16.msra.mxu1 %v2391_v32 }
  0x65   : > { %2267 = vmatprep.subr.bf16.mxu0 %v2386_v27  ;;  %2317 = vmatprep.subr.bf16.mxu1 %v2394_v35  ;;  %v3113_v27 = vld [vmem:[%s3013_s27 + $0x18] sm:$0xff]  }
  0x66   : > { %935 = vadd.xlane.f32.xlu1 %v922_v41  ;;  %933 = vadd.xlane.f32.xlu0 %v921_v43  ;;  %v2396_v41 = vld [vmem:[%s3662_s3 + $0x30] sm:$0xff]   ;;  %v2397_v43 = vld [vmem:[%s3662_s3 + $0x98] sm:$0xff]  }
  0x68   : > { %2268 = vmatpush3.bf16.msra.mxu0 %v2387_v28  ;;  %2318 = vmatpush3.bf16.msra.mxu1 %v2394_v35  ;;  %v3122_v35 = vld [vmem:[%s3013_s27 + $0x38] sm:$0xff]  }
  0x69   : > { %2269 = vmatprep.subr.bf16.mxu0 %v2389_v30  ;;  %2319 = vmatprep.subr.bf16.mxu1 %v2397_v43 }
  0x6a   : > { %1235 = vadd.xlane.f32.xlu1 %v1226_v51  ;;  %1233 = vadd.xlane.f32.xlu0 %v1225_v53  ;;  %v2401_v51 = vld [vmem:[%s3662_s3 + $0xa0] sm:$0xff]  }
  0x6b   : > { %v2402_v53 = vld [vmem:[%s3024_s20] sm:$0xff]  }
  0x6c   : > { %2270 = vmatpush3.bf16.msra.mxu0 %v2390_v31  ;;  %2320 = vmatpush3.bf16.msra.mxu1 %v2397_v43 }
  0x6d   : > { %2271 = vmatprep.subr.bf16.mxu0 %v2392_v33  ;;  %2321 = vmatprep.subr.bf16.mxu1 %v2401_v51  ;;  %v2146_v33 = vunpack.c.h.bf16 %v3107_v21 }
  0x6e   : > { %939 = vadd.xlane.f32.xlu1 %v924_v57  ;;  %937 = vadd.xlane.f32.xlu0 %v923_v58  ;;  %v2406_v57 = vld [vmem:[%s3024_s20 + $0x8] sm:$0xff]   ;;  %v2407_v58 = vld [vmem:[%s3662_s3 + $0xb8] sm:$0xff]  }
  0x70   : > { %2272 = vmatpush3.bf16.msra.mxu0 %v2393_v34  ;;  %2322 = vmatpush3.bf16.msra.mxu1 %v2401_v51  ;;  %v3119_v34 = vld [vmem:[%s3013_s27 + $0x30] sm:$0xff]  }
  0x71   : > { %2273 = vmatprep.subr.bf16.mxu0 %v2395_v38  ;;  %2323 = vmatprep.subr.bf16.mxu1 %v2403_v54 }
  0x72   : > { %1239 = vadd.xlane.f32.xlu1 %v1228_v62  ;;  %1237 = vadd.xlane.f32.xlu0 %v1227_v52  ;;  %v2086_v62 = vld [vmem:[%s3665_s6] ss:$0 sm:$0xff] }
  0x73   : > { %v1757_v52 = vmul.f32 %v2105_v42, %v2086_v62  ;;  %v1758_v49 = vmul.f32 %v2106_v47, %v2086_v62  ;;  %v1759_v63 = vmul.f32 %v2109_v40, %v2086_v62  ;;  %v1760_v0 = vmul.f32 %v2110_v44, %v2086_v62  ;;  %v3068_v47 = vld [vmem:[%s3013_s27 + $0x8] sm:$0xff]  }
  0x74   : > { %2274 = vmatpush3.bf16.msra.mxu0 %v2396_v41  ;;  %2324 = vmatpush3.bf16.msra.mxu1 %v2403_v54  ;;  %v1761_v42 = vmul.f32 %v2113_v15, %v2086_v62  ;;  %v1762_v39 = vmul.f32 %v2114_v14, %v2086_v62  ;;  %v1763_v37 = vmul.f32 %v2117_v24, %v2086_v62  ;;  %v3091_v24 = vld [vmem:[%s3013_s27 + $0x28] sm:$0xff]   ;;  %v2141_v9 = vunpack.c.l.bf16 %v3068_v47 }
  0x75   : > { %2275 = vmatprep.subr.bf16.mxu0 %v2398_v45  ;;  %2325 = vmatprep.subr.bf16.mxu1 %v2405_v56  ;;  %v1764_v40 = vmul.f32 %v2118_v19, %v2086_v62  ;;  %v2174_v20 = vunpack.c.h.bf16 %v3091_v24  ;;  %v2173_v23 = vunpack.c.l.bf16 %v3091_v24 }
  0x76   : > { %1089 = vadd.xlane.f32.xlu1 %v1076_v1  ;;  %1087 = vadd.xlane.f32.xlu0 %v1075_v2  ;;  %v2411_v1 = vld [vmem:[%s3024_s20 + $0x18] sm:$0xff]   ;;  %v3071_v2 = vld [vmem:[%s3013_s27] sm:$0xff]   ;;  %s3589_s20 = scalar_lea.vmem [#allocation5], %s1993_s16 }
  0x77   : > { %v2137_v19 = vunpack.c.l.bf16 %v3071_v2  ;;  %s1885_s22 = sshll.u32 %s3589_s20, 4  ;;  %s3613_s22 = int_to_ptr.vmem [resolvable:$true] %s1885_s22 }
  0x78   : > { %2276 = vmatpush3.bf16.msra.mxu0 %v2399_v36  ;;  %2326 = vmatpush3.bf16.msra.mxu1 %v2405_v56  ;;  %s2593_s26 = scalar_lea.vmem %s3613_s22, 1024  ;;  %p2600_p3 = scmp.lt.s32.totalorder %s3613_s22, %s2598_s11 }
  0x79   : > { %2327 = vmatprep.subr.bf16.mxu1 %v2407_v58  ;;  %p2594_p0 = scmp.ne.s32.totalorder %s3613_s22, %s2593_s26 }
  0x7a   : > { %1093 = vadd.xlane.f32.xlu1 %v1078_v7  ;;  %1091 = vadd.xlane.f32.xlu0 %v1077_v50  ;;  %v2142_v7 = vunpack.c.h.bf16 %v3068_v47  ;;  %v2138_v50 = vunpack.c.h.bf16 %v3071_v2 }
  0x7b   : > { %1653 = vmatmul.mubr.bf16.vlgmr.msra.gmra.mrb[0].mxu0 %v2402_v53  ;;  %p2595_p1 = pnand %p2594_p0, %p2751_p6 }
  0x7c   : > { %1660 = vmatprep.mubr.bf16.mxu0 %v3032_v55  ;;  %2328 = vmatpush3.bf16.msra.mxu1 %v2407_v58 }
  0x7d   : > { %p2596_p2 = pneg %p2595_p1 }
  0x7e   : > { %1243 = vadd.xlane.f32.xlu1 %v1230_v11  ;;  %1241 = vadd.xlane.f32.xlu0 %v1229_v12  ;;  %v2170_v12 = vunpack.c.h.bf16 %v3082_v4 }
  0x82   : > { %1247 = vadd.xlane.f32.xlu1 %v1232_v17  ;;  %1245 = vadd.xlane.f32.xlu0 %v1231_v18  ;;  %v2169_v18 = vunpack.c.l.bf16 %v3082_v4 }
  0x83   : > { %1661 = vmatmul.mubr.bf16.gmra.mrb[4].mxu0 %v2406_v57 }
  0x84   : > { %1668 = vmatprep.mubr.bf16.mxu0 %v3043_v59 }
  0x86   : > { %1765 = vadd.xlane.f32.xlu0 %v1757_v52  ;;  %1767 = vadd.xlane.f32.xlu1 %v1758_v49 }
  0x8a   : > { %1769 = vadd.xlane.f32.xlu0 %v1759_v63  ;;  %1771 = vadd.xlane.f32.xlu1 %v1760_v0  ;;  %v3140_v63 = vld [vmem:[%s3013_s27 + $0x50] sm:$0xff]  }
  0x8b   : > { %1669 = vmatmul.mubr.bf16.gmra.mrb[8].mxu0 %v2409_v60 }
  0x8c   : > { %1676 = vmatprep.mubr.bf16.mxu0 %v3048_v61 }
  0x8e   : > { %1773 = vadd.xlane.f32.xlu0 %v1761_v42  ;;  %1775 = vadd.xlane.f32.xlu1 %v1762_v39 }
  0x92   : > { %1777 = vadd.xlane.f32.xlu0 %v1763_v37  ;;  %1779 = vadd.xlane.f32.xlu1 %v1764_v40 }
  0x93   : > { %1677 = vmatmul.mubr.bf16.gmra.mrb[12].mxu0 %v2411_v1 }
  0xd3   : > { %v3077_v44 = vpop.xlane.xlu1 %792  ;;  %v3079_v15 = vpop.xlane.xlu0 %788 }
  0xd4   : > { %v806_v14 = vsub.f32 -inf, %v3077_v44  ;;  %v830_v3 = vsub.f32 %v3077_v44, %v3077_v44  ;;  %v804_v5 = vsub.f32 -inf, %v3079_v15  ;;  %v828_v6 = vsub.f32 %v3079_v15, %v3079_v15 }
  0xd6   : > { %v816_v48 = vmul.f32 1.442695, %v806_v14  ;;  %v840_v10 = vmul.f32 1.442695, %v830_v3  ;;  %v812_v11 = vmul.f32 1.442695, %v804_v5 }
  0xd7   : > { %v836_v13 = vmul.f32 1.442695, %v828_v6  ;;  %v3101_v16 = vpop.xlane.xlu1 %794  ;;  %v791_v17 = vpop.xlane.xlu0 %790  ;;  %v3149_v5 = vld [vmem:[%s3013_s27 + $0x58] sm:$0xff]  }
  0xd8   : > { %2416 = vpow2.f32 %v816_v48  ;;  %v807_v22 = vsub.f32 -inf, %v3101_v16  ;;  %v831_v25 = vsub.f32 %v3101_v16, %v3101_v16  ;;  %v805_v26 = vsub.f32 -inf, %v791_v17  ;;  %3682 = vst [vmem:[#allocation10_spill] sm:$0xff] %v3149_v5 }
  0xd9   : > { %2418 = vpow2.f32 %v840_v10  ;;  %v829_v28 = vsub.f32 %v791_v17, %v791_v17 }
  0xda   : > { %2420 = vpow2.f32 %v812_v11  ;;  %v818_v31 = vmul.f32 1.442695, %v807_v22  ;;  %v814_v32 = vmul.f32 1.442695, %v805_v26  ;;  %v842_v38 = vmul.f32 1.442695, %v831_v25 }
  0xdb   : > { %v928_v41 = vpop.xlane.xlu1 %927  ;;  %v926_v43 = vpop.xlane.xlu0 %925  ;;  %2422 = vpow2.f32 %v836_v13  ;;  %v838_v53 = vmul.f32 1.442695, %v829_v28  ;;  %v3160_v25 = vld [vmem:[%s3013_s27 + $0x40] sm:$0xff]  }
  0xdc   : > { %v3127_v54 = vmax.f32 %v791_v17, %v928_v41  ;;  %v3130_v56 = vmax.f32 %v3079_v15, %v926_v43  ;;  %2424 = vpow2.f32 %v818_v31 }
  0xdd   : > { %2426 = vpow2.f32 %v814_v32 }
  0xde   : > { %v950_v62 = vsub.f32 %v791_v17, %v3127_v54  ;;  %v974_v52 = vsub.f32 %v928_v41, %v3127_v54  ;;  %v949_v49 = vsub.f32 %v3079_v15, %v3130_v56  ;;  %2428 = vpow2.f32 %v842_v38 }
  0xdf   : > { %v973_v0 = vsub.f32 %v926_v43, %v3130_v56  ;;  %v932_v1 = vpop.xlane.xlu1 %931  ;;  %v930_v42 = vpop.xlane.xlu0 %929  ;;  %2430 = vpow2.f32 %v838_v53 }
  0xe0   : > { %v959_v40 = vmul.f32 1.442695, %v950_v62  ;;  %v957_v14 = vmul.f32 1.442695, %v949_v49  ;;  %v3146_v3 = vmax.f32 %v3101_v16, %v932_v1  ;;  %v983_v15 = vmul.f32 1.442695, %v974_v52 }
  0xe1   : > { %v3152_v6 = vmax.f32 %v3077_v44, %v930_v42  ;;  %v981_v13 = vmul.f32 1.442695, %v973_v0 }
  0xe2   : > { %v2417_v11 = vpop.eup %2416  ;;  %2432 = vpow2.f32 %v959_v40  ;;  %v952_v17 = vsub.f32 %v3101_v16, %v3146_v3  ;;  %v976_v28 = vsub.f32 %v932_v1, %v3146_v3 }
  0xe3   : > { %v2419_v26 = vpop.eup %2418  ;;  %v1082_v31 = vpop.xlane.xlu1 %1081  ;;  %v854_v62 = vmul.f32 0.0, %v2417_v11  ;;  %2434 = vpow2.f32 %v957_v14  ;;  %v951_v16 = vsub.f32 %v3077_v44, %v3152_v6  ;;  %v975_v38 = vsub.f32 %v930_v42, %v3152_v6 }
  0xe4   : > { %v3163_v32 = vpop.xlane.xlu0 %1079  ;;  %v2421_v53 = vpop.eup %2420  ;;  %v886_v49 = vmul.f32 %v2419_v26, %v2141_v9  ;;  %2436 = vpow2.f32 %v983_v15  ;;  %v963_v0 = vmul.f32 1.442695, %v952_v17  ;;  %v987_v44 = vmul.f32 1.442695, %v976_v28 }
  0xe5   : > { %v2423_v40 = vpop.eup %2422  ;;  %2438 = vpow2.f32 %v981_v13  ;;  %v852_v41 = vmul.f32 0.0, %v2421_v53  ;;  %v3178_v52 = vmax.f32 %v3127_v54, %v1082_v31  ;;  %v3183_v1 = vadd.f32 %v2419_v26, %v854_v62 }
  0xe6   : > { %v2425_v11 = vpop.eup %2424  ;;  %v961_v13 = vmul.f32 1.442695, %v951_v16  ;;  %v3187_v42 = vmax.f32 %v3130_v56, %v3163_v32  ;;  %v3190_v28 = vadd.f32 %v886_v49, %v854_v62  ;;  %2440 = vpow2.f32 %v963_v0 }
  0xe7   : > { %v1086_v22 = vpop.xlane.xlu1 %1085  ;;  %v2427_v17 = vpop.eup %2426  ;;  %v1104_v10 = vsub.f32 %v3127_v54, %v3178_v52  ;;  %v884_v26 = vmul.f32 %v2423_v40, %v2137_v19  ;;  %v985_v15 = vmul.f32 1.442695, %v975_v38  ;;  %v1128_v16 = vsub.f32 %v1082_v31, %v3178_v52 }
  0xe8   : > { %v3180_v9 = vpop.xlane.xlu0 %1083  ;;  %v2429_v53 = vpop.eup %2428  ;;  %v853_v43 = vmul.f32 0.0, %v2427_v17  ;;  %v1103_v37 = vsub.f32 %v3130_v56, %v3187_v42  ;;  %v860_v39 = vadd.f32 %v2423_v40, %v852_v41  ;;  %v855_v14 = vmul.f32 0.0, %v2425_v11 }
  0xe9   : > { %v2431_v48 = vpop.eup %2430  ;;  %2442 = vpow2.f32 %v987_v44  ;;  %v3200_v62 = vmax.f32 %v3146_v3, %v1086_v22  ;;  %v887_v19 = vmul.f32 %v2429_v53, %v2142_v7  ;;  %v1113_v38 = vmul.f32 1.442695, %v1104_v10 }
  0xea   : > { %v1127_v31 = vsub.f32 %v3163_v32, %v3187_v42  ;;  %v3214_v56 = vmax.f32 %v3152_v6, %v3180_v9  ;;  %v861_v40 = vadd.f32 %v2431_v48, %v853_v43  ;;  %v885_v11 = vmul.f32 %v2431_v48, %v2138_v50 }
  0xeb   : > { %v3202_v49 = vpop.xlane.xlu1 %798  ;;  %v1137_v44 = vmul.f32 1.442695, %v1128_v16  ;;  %v1106_v17 = vsub.f32 %v3146_v3, %v3200_v62  ;;  %2444 = vpow2.f32 %v961_v13  ;;  %v1111_v47 = vmul.f32 1.442695, %v1103_v37 }
  0xec   : > { %v3204_v0 = vpop.xlane.xlu0 %796  ;;  %v3206_v54 = vpop.eup %2432  ;;  %v1130_v7 = vsub.f32 %v1086_v22, %v3200_v62  ;;  %v1105_v10 = vsub.f32 %v3152_v6, %v3214_v56  ;;  %v3225_v58 = vadd.f32 %v884_v26, %v852_v41  ;;  %2446 = vpow2.f32 %v985_v15 }
  0xed   : > { %v3220_v60 = vpop.eup %2434  ;;  %v998_v57 = vmul.f32 %v3206_v54, %v861_v40  ;;  %v1117_v2 = vmul.f32 1.442695, %v1106_v17  ;;  %v863_v16 = vadd.f32 %v2429_v53, %v855_v14  ;;  %2448 = vpow2.f32 %v1113_v38 }
  0xee   : > { %v2437_v32 = vpop.eup %2436  ;;  %v997_v37 = vmul.f32 %v3220_v60, %v860_v39  ;;  %v1135_v22 = vmul.f32 1.442695, %v1127_v31  ;;  %v895_v13 = vadd.f32 %v887_v19, %v855_v14  ;;  %v3233_v51 = vadd.f32 %v885_v11, %v853_v43 }
  0xef   : > { %v3228_v50 = vpop.xlane.xlu1 %802  ;;  %v2439_v3 = vpop.eup %2438  ;;  %2450 = vpow2.f32 %v1137_v44  ;;  %v1141_v6 = vmul.f32 1.442695, %v1130_v7  ;;  %v1115_v41 = vmul.f32 1.442695, %v1105_v10  ;;  %v1129_v15 = vsub.f32 %v3180_v9, %v3214_v56 }
  0xf0   : > { %v3230_v48 = vpop.xlane.xlu0 %800  ;;  %2452 = vpow2.f32 %v1111_v47  ;;  %v809_v26 = vsub.f32 -inf, %v3202_v49  ;;  %v2441_v40 = vpop.eup %2440  ;;  %v1006_v17 = vadd.f32 %v2437_v32, %v998_v57  ;;  %v3240_v53 = vmul.f32 %v2437_v32, %v2170_v12 }
  0xf1   : > { %v3244_v39 = vmul.f32 %v2439_v3, %v2169_v18  ;;  %2454 = vpow2.f32 %v1117_v2  ;;  %v1005_v19 = vadd.f32 %v2439_v3, %v997_v37  ;;  %v1139_v38 = vmul.f32 1.442695, %v1129_v15 }
  0xf2   : > { %2456 = vpow2.f32 %v1135_v22  ;;  %v822_v9 = vmul.f32 1.442695, %v809_v26  ;;  %v833_v57 = vsub.f32 %v3202_v49, %v3202_v49  ;;  %v808_v12 = vsub.f32 -inf, %v3204_v0 }
  0xf3   : > { %v936_v43 = vpop.xlane.xlu1 %935  ;;  %v2443_v31 = vpop.eup %2442  ;;  %2458 = vpow2.f32 %v1141_v6  ;;  %v832_v4 = vsub.f32 %v3204_v0, %v3204_v0  ;;  %v1000_v18 = vmul.f32 %v2441_v40, %v863_v16  ;;  %v811_v11 = vsub.f32 -inf, %v3228_v50 }
  0xf4   : > { %v3246_v14 = vpop.xlane.xlu0 %933  ;;  %2460 = vpow2.f32 %v1115_v41  ;;  %v835_v44 = vsub.f32 %v3228_v50, %v3228_v50  ;;  %v846_v47 = vmul.f32 1.442695, %v833_v57  ;;  %v820_v7 = vmul.f32 1.442695, %v808_v12 }
  0xf5   : > { %2462 = vpow2.f32 %v1139_v38  ;;  %v844_v10 = vmul.f32 1.442695, %v832_v4  ;;  %v2445_v2 = vpop.eup %2444  ;;  %v826_v3 = vmul.f32 1.442695, %v811_v11  ;;  %v810_v22 = vsub.f32 -inf, %v3230_v48 }
  0xf6   : > { %2464 = vpow2.f32 %v822_v9  ;;  %v850_v37 = vmul.f32 1.442695, %v835_v44  ;;  %v2447_v16 = vpop.eup %2446  ;;  %v834_v41 = vsub.f32 %v3230_v48, %v3230_v48  ;;  %v3264_v15 = vmax.f32 %v3202_v49, %v936_v43 }
  0xf7   : > { %v3256_v32 = vpop.xlane.xlu1 %1235  ;;  %2466 = vpow2.f32 %v846_v47  ;;  %v3268_v26 = vmax.f32 %v3204_v0, %v3246_v14  ;;  %v3270_v38 = vpop.eup %2448  ;;  %v1016_v9 = vmul.f32 %v2441_v40, %v895_v13  ;;  %v1041_v57 = vmul.f32 %v2443_v31, %v2174_v20 }
  0xf8   : > { %v3259_v6 = vpop.xlane.xlu0 %1233  ;;  %3683 = vst [vmem:[#allocation11_spill] sm:$0xff] %v3270_v38  ;;  %2468 = vpow2.f32 %v820_v7  ;;  %v824_v12 = vmul.f32 1.442695, %v810_v22  ;;  %v999_v11 = vmul.f32 %v2445_v2, %v3183_v1  ;;  %v954_v44 = vsub.f32 %v3202_v49, %v3264_v15 }
  0xf9   : > { %v3274_v4 = vpop.eup %2450  ;;  %2470 = vpow2.f32 %v844_v10  ;;  %v978_v47 = vsub.f32 %v936_v43, %v3264_v15  ;;  %v1015_v13 = vmul.f32 %v2445_v2, %v3190_v28  ;;  %v1040_v20 = vmul.f32 %v2447_v16, %v2173_v23 }
  0xfa   : > { %3684 = vst [vmem:[#allocation12_spill] sm:$0xff] %v3274_v4  ;;  %v3282_v36 = vpop.eup %2452  ;;  %2472 = vpow2.f32 %v826_v3  ;;  %v848_v40 = vmul.f32 1.442695, %v834_v41  ;;  %v1152_v1 = vmul.f32 %v3270_v38, %v1006_v17  ;;  %v967_v10 = vmul.f32 1.442695, %v954_v44 }
  0xfb   : > { %v3280_v30 = vpop.xlane.xlu1 %939  ;;  %v3287_v7 = vpop.eup %2454  ;;  %2474 = vpow2.f32 %v850_v37  ;;  %v953_v49 = vsub.f32 %v3204_v0, %v3268_v26  ;;  %v1008_v22 = vadd.f32 %v2443_v31, %v1000_v18  ;;  %v3294_v45 = vadd.f32 %v1041_v57, %v1016_v9 }
  0xfc   : > { %v3292_v43 = vpop.eup %2456  ;;  %2476 = vpow2.f32 %v824_v12  ;;  %v991_v28 = vmul.f32 1.442695, %v978_v47  ;;  %v3296_v24 = vpop.xlane.xlu0 %937  ;;  %v1151_v2 = vmul.f32 %v3282_v36, %v1005_v19  ;;  %v977_v17 = vsub.f32 %v3246_v14, %v3268_v26 }
  0xfd   : > { %3685 = vst [vmem:[#allocation13_spill] sm:$0xff] %v3292_v43  ;;  %v2459_v23 = vpop.eup %2458  ;;  %v1250_v3 = vmax.f32 %v3178_v52, %v3256_v32  ;;  %v1249_v0 = vmax.f32 %v3187_v42, %v3259_v6  ;;  %v1007_v31 = vadd.f32 %v2447_v16, %v999_v11  ;;  %v1154_v18 = vmul.f32 %v3287_v7, %v1008_v22 }
  0xfe   : > { %v3305_v37 = vpop.eup %2460  ;;  %2478 = vpow2.f32 %v848_v40  ;;  %v3310_v41 = vmax.f32 %v3228_v50, %v3280_v30  ;;  %v3312_v9 = vadd.f32 %v1040_v20, %v1015_v13  ;;  %v3315_v14 = vadd.f32 %v3274_v4, %v1152_v1 }
  0xff   : > { %v2463_v19 = vpop.eup %2462  ;;  %2480 = vpow2.f32 %v967_v10  ;;  %v965_v57 = vmul.f32 1.442695, %v953_v49  ;;  %v3317_v12 = vpop.xlane.xlu1 %1239  ;;  %v989_v16 = vmul.f32 1.442695, %v977_v17  ;;  %v1258_v11 = vsub.f32 %v3178_v52, %v1250_v3 }
 0x100   : > { %v2465_v44 = vpop.eup %2464  ;;  %2482 = vpow2.f32 %v991_v28  ;;  %v1282_v47 = vsub.f32 %v3256_v32, %v1250_v3  ;;  %v3322_v22 = vadd.f32 %v3292_v43, %v1151_v2  ;;  %v3326_v13 = vmul.f32 %v2459_v23, %v2206_v29  ;;  %v3335_v17 = vpop.xlane.xlu0 %1237 }
 0x101   : > { %v2467_v40 = vpop.eup %2466  ;;  %v1257_v20 = vsub.f32 %v3187_v42, %v1249_v0  ;;  %v1281_v1 = vsub.f32 %v3259_v6, %v1249_v0  ;;  %v3330_v49 = vadd.f32 %v2459_v23, %v1154_v18  ;;  %v1153_v28 = vmul.f32 %v3305_v37, %v1007_v31 }
 0x102   : > { %3686 = vst [vmem:[#allocation14_spill] sm:$0xff] %v3326_v13  ;;  %v2469_v10 = vpop.eup %2468  ;;  %v1267_v52 = vmul.f32 1.442695, %v1258_v11  ;;  %v956_v32 = vsub.f32 %v3228_v50, %v3310_v41  ;;  %2484 = vpow2.f32 %v965_v57  ;;  %v1291_v3 = vmul.f32 1.442695, %v1282_v47 }
 0x103   : > { %v2471_v2 = vpop.eup %2470  ;;  %v3339_v29 = vmax.f32 %v3230_v48, %v3296_v24  ;;  %v1252_v42 = vmax.f32 %v3200_v62, %v3317_v12  ;;  %v857_v23 = vmul.f32 0.0, %v2465_v44  ;;  %2486 = vpow2.f32 %v989_v16  ;;  %v3349_v59 = vpop.xlane.xlu1 %1089 }
 0x104   : > { %v2473_v6 = vpop.eup %2472  ;;  %v1265_v0 = vmul.f32 1.442695, %v1257_v20  ;;  %v980_v31 = vsub.f32 %v3280_v30, %v3310_v41  ;;  %v889_v18 = vmul.f32 %v2467_v40, %v2146_v33  ;;  %v856_v57 = vmul.f32 0.0, %v2469_v10  ;;  %v3361_v38 = vpop.xlane.xlu0 %1087 }
 0x105   : > { %v2475_v50 = vpop.eup %2474  ;;  %v3687_v11 = vunpack.c.l.bf16 %v3107_v21  ;;  %v1289_v61 = vmul.f32 1.442695, %v1281_v1  ;;  %v859_v13 = vmul.f32 0.0, %v2473_v6  ;;  %v3688_v44 = vunpack.c.h.bf16 %v3113_v27 }
 0x106   : > { %v2477_v5 = vpop.eup %2476  ;;  %2488 = vpow2.f32 %v1267_v52  ;;  %v971_v20 = vmul.f32 1.442695, %v956_v32  ;;  %v3353_v4 = vadd.f32 %v2463_v19, %v1153_v28  ;;  %v955_v33 = vsub.f32 %v3230_v48, %v3339_v29 }
 0x107   : > { %v888_v47 = vmul.f32 %v2471_v2, %v3687_v11  ;;  %v891_v16 = vmul.f32 %v2475_v50, %v3688_v44  ;;  %v858_v30 = vmul.f32 0.0, %v2477_v5  ;;  %2490 = vpow2.f32 %v1291_v3 }
 0x108   : > { %v2479_v10 = vpop.eup %2478  ;;  %v3689_v21 = vunpack.c.l.bf16 %v3098_v8  ;;  %v865_v11 = vadd.f32 %v2467_v40, %v857_v23  ;;  %2492 = vpow2.f32 %v1265_v0  ;;  %v995_v6 = vmul.f32 1.442695, %v980_v31 }
 0x109   : > { %v2481_v44 = vpop.eup %2480  ;;  %v897_v52 = vadd.f32 %v889_v18, %v857_v23  ;;  %v864_v32 = vadd.f32 %v2471_v2, %v856_v57  ;;  %v896_v28 = vadd.f32 %v888_v47, %v856_v57  ;;  %2494 = vpow2.f32 %v1289_v61  ;;  %v1094_v2 = vpop.xlane.xlu1 %1093 }
 0x10a   : > { %v3359_v1 = vmul.f32 %v2463_v19, %v3689_v21  ;;  %v2483_v5 = vpop.eup %2482  ;;  %v3363_v3 = vadd.f32 %v2475_v50, %v859_v13  ;;  %v3365_v43 = vadd.f32 %v891_v16, %v859_v13  ;;  %2496 = vpow2.f32 %v971_v20 }
 0x10b   : > { %v979_v8 = vsub.f32 %v3296_v24, %v3339_v29  ;;  %v3369_v48 = vadd.f32 %v2479_v10, %v858_v30  ;;  %v3690_v19 = vunpack.c.l.bf16 %v3113_v27  ;;  %v969_v0 = vmul.f32 1.442695, %v955_v33 }
 0x10c   : > { %v1260_v23 = vsub.f32 %v3200_v62, %v1252_v42  ;;  %v1002_v31 = vmul.f32 %v2481_v44, %v865_v11  ;;  %v1018_v61 = vmul.f32 %v2481_v44, %v897_v52  ;;  %2498 = vpow2.f32 %v995_v6  ;;  %v2485_v13 = vpop.eup %2484 }
 0x10d   : > { %v890_v40 = vmul.f32 %v2479_v10, %v3690_v19  ;;  %v1284_v50 = vsub.f32 %v3317_v12, %v1252_v42  ;;  %v3691_v18 = vunpack.c.h.bf16 %v3119_v34  ;;  %v1251_v24 = vmax.f32 %v3214_v56, %v3335_v17  ;;  %v2487_v16 = vpop.eup %2486  ;;  %v1092_v42 = vpop.xlane.xlu0 %1091 }
 0x10e   : > { %v1271_v47 = vmul.f32 1.442695, %v1260_v23  ;;  %v3381_v27 = vmax.f32 %v3264_v15, %v3349_v59  ;;  %v993_v62 = vmul.f32 1.442695, %v979_v8  ;;  %v3385_v33 = vmax.f32 %v3268_v26, %v3361_v38 }
 0x10f   : > { %v1043_v57 = vmul.f32 %v2483_v5, %v3691_v18  ;;  %v1295_v20 = vmul.f32 1.442695, %v1284_v50  ;;  %v3388_v12 = vmax.f32 %v3310_v41, %v1094_v2  ;;  %v1259_v10 = vsub.f32 %v3214_v56, %v1251_v24 }
 0x110   : > { %2500 = vpow2.f32 %v1271_v47  ;;  %v1283_v21 = vsub.f32 %v3335_v17, %v1251_v24  ;;  %v1108_v11 = vsub.f32 %v3264_v15, %v3381_v27  ;;  %v3394_v6 = vpop.eup %2488  ;;  %v1001_v44 = vmul.f32 %v2485_v13, %v864_v32 }
 0x111   : > { %2502 = vpow2.f32 %v969_v0  ;;  %v1132_v52 = vsub.f32 %v3349_v59, %v3381_v27  ;;  %v1107_v8 = vsub.f32 %v3268_v26, %v3385_v33  ;;  %v3400_v19 = vpop.eup %2490  ;;  %v1269_v23 = vmul.f32 1.442695, %v1259_v10  ;;  %v1244_v0 = vpop.xlane.xlu1 %1243 }
 0x112   : > { %2504 = vpow2.f32 %v1295_v20  ;;  %v1121_v56 = vmul.f32 1.442695, %v1108_v11  ;;  %v1131_v17 = vsub.f32 %v3361_v38, %v3385_v33  ;;  %v3404_v50 = vpop.eup %2492  ;;  %v3406_v15 = vadd.f32 %v890_v40, %v858_v30 }
 0x113   : > { %2506 = vpow2.f32 %v993_v62  ;;  %v1293_v32 = vmul.f32 1.442695, %v1283_v21  ;;  %v1110_v59 = vsub.f32 %v3310_v41, %v3388_v12  ;;  %v3410_v18 = vpop.eup %2494  ;;  %v3412_v26 = vadd.f32 %v2483_v5, %v1002_v31  ;;  %v1242_v62 = vpop.xlane.xlu0 %1241 }
 0x114   : > { %v3414_v47 = vmul.f32 %v2485_v13, %v896_v28  ;;  %2508 = vpow2.f32 %v1269_v23  ;;  %v1119_v24 = vmul.f32 1.442695, %v1107_v8  ;;  %v2497_v20 = vpop.eup %2496  ;;  %v3416_v38 = vadd.f32 %v1043_v57, %v1018_v61 }
 0x115   : > { %v1145_v10 = vmul.f32 1.442695, %v1132_v52  ;;  %v1134_v30 = vsub.f32 %v1094_v2, %v3388_v12  ;;  %v3420_v40 = vmax.f32 %v3339_v29, %v1092_v42  ;;  %v3422_v41 = vadd.f32 %v2487_v16, %v1001_v44  ;;  %v1248_v8 = vpop.xlane.xlu1 %1247 }
 0x116   : > { %v3692_v21 = vunpack.c.l.bf16 %v3119_v34  ;;  %2510 = vpow2.f32 %v1121_v56  ;;  %v1143_v28 = vmul.f32 1.442695, %v1131_v17  ;;  %v2499_v31 = vpop.eup %2498  ;;  %v1125_v13 = vmul.f32 1.442695, %v1110_v59 }
 0x117   : > { %2512 = vpow2.f32 %v1293_v32  ;;  %v1109_v61 = vsub.f32 %v3339_v29, %v3420_v40  ;;  %v1133_v57 = vsub.f32 %v1092_v42, %v3420_v40  ;;  %v1004_v2 = vmul.f32 %v2497_v20, %v3363_v3  ;;  %v1246_v59 = vpop.xlane.xlu0 %1245 }
 0x118   : > { %v1042_v5 = vmul.f32 %v2487_v16, %v3692_v21  ;;  %v1020_v11 = vmul.f32 %v2497_v20, %v3365_v43  ;;  %2514 = vpow2.f32 %v1119_v24  ;;  %v1254_v44 = vmax.f32 %v3381_v27, %v1244_v0 }
 0x119   : > { %2516 = vpow2.f32 %v1145_v10  ;;  %v1149_v34 = vmul.f32 1.442695, %v1134_v30  ;;  %v1123_v16 = vmul.f32 1.442695, %v1109_v61  ;;  %v1253_v52 = vmax.f32 %v3385_v33, %v1242_v62 }
 0x11a   : > { %v3433_v23 = vpop.eup %2500  ;;  %2518 = vpow2.f32 %v1143_v28  ;;  %v1147_v56 = vmul.f32 1.442695, %v1133_v57  ;;  %v1262_v29 = vsub.f32 %v3381_v27, %v1254_v44  ;;  %v1286_v42 = vsub.f32 %v1244_v0, %v1254_v44 }
 0x11b   : > { %v2503_v17 = vpop.eup %2502  ;;  %v1308_v43 = vmul.f32 %v3433_v23, %v3330_v49  ;;  %2520 = vpow2.f32 %v1125_v13  ;;  %v1261_v3 = vsub.f32 %v3385_v33, %v1253_v52  ;;  %v1285_v32 = vsub.f32 %v1242_v62, %v1253_v52 }
 0x11c   : > { %v3439_v24 = vpop.eup %2504  ;;  %2522 = vpow2.f32 %v1123_v16  ;;  %v1275_v20 = vmul.f32 1.442695, %v1262_v29  ;;  %v1299_v10 = vmul.f32 1.442695, %v1286_v42  ;;  %v1256_v30 = vmax.f32 %v3388_v12, %v1248_v8 }
 0x11d   : > { %v2507_v21 = vpop.eup %2506  ;;  %v3693_v27 = vunpack.c.h.bf16 %v3122_v35  ;;  %v1316_v28 = vadd.f32 %v3439_v24, %v1308_v43  ;;  %2524 = vpow2.f32 %v1149_v34  ;;  %v1273_v49 = vmul.f32 1.442695, %v1261_v3 }
 0x11e   : > { %v3445_v13 = vpop.eup %2508  ;;  %2526 = vpow2.f32 %v1275_v20  ;;  %v1264_v33 = vsub.f32 %v3388_v12, %v1256_v30  ;;  %v1288_v62 = vsub.f32 %v1248_v8, %v1256_v30  ;;  %v1255_v61 = vmax.f32 %v3420_v40, %v1246_v59 }
 0x11f   : > { %v1045_v0 = vmul.f32 %v2499_v31, %v3693_v27  ;;  %v1003_v57 = vmul.f32 %v2503_v17, %v3369_v48  ;;  %v1307_v44 = vmul.f32 %v3445_v13, %v3353_v4  ;;  %2528 = vpow2.f32 %v1147_v56 }
 0x120   : > { %v1297_v16 = vmul.f32 1.442695, %v1285_v32  ;;  %v3452_v52 = vpop.eup %2510  ;;  %v1019_v34 = vmul.f32 %v2503_v17, %v3406_v15  ;;  %2530 = vpow2.f32 %v1299_v10  ;;  %v1279_v29 = vmul.f32 1.442695, %v1264_v33 }
 0x121   : > { %v1263_v42 = vsub.f32 %v3420_v40, %v1255_v61  ;;  %v2513_v43 = vpop.eup %2512  ;;  %v3694_v12 = vunpack.c.l.bf16 %v3122_v35  ;;  %2532 = vpow2.f32 %v1273_v49  ;;  %v1303_v3 = vmul.f32 1.442695, %v1288_v62 }
 0x122   : > { %v1287_v48 = vsub.f32 %v1246_v59, %v1255_v61  ;;  %v3458_v20 = vpop.eup %2514  ;;  %v3461_v4 = vadd.f32 %v1042_v5, %v3414_v47  ;;  %v1012_v56 = vadd.f32 %v2499_v31, %v1004_v2  ;;  %2534 = vrcp.f32 %v1316_v28 }
 0x123   : > { %v1044_v8 = vmul.f32 %v2507_v21, %v3694_v12  ;;  %v1277_v32 = vmul.f32 1.442695, %v1263_v42  ;;  %v2517_v15 = vpop.eup %2516  ;;  %v3463_v17 = vadd.f32 %v1045_v0, %v1020_v11  ;;  %v1315_v10 = vadd.f32 %v2513_v43, %v1307_v44 }
 0x124   : > { %v1156_v40 = vmul.f32 %v3452_v52, %v3412_v26  ;;  %2536 = vpow2.f32 %v1297_v16  ;;  %v2519_v35 = vpop.eup %2518  ;;  %v1011_v30 = vadd.f32 %v2507_v21, %v1003_v57  ;;  %v1155_v59 = vmul.f32 %v3458_v20, %v3422_v41 }
 0x125   : > { %2538 = vpow2.f32 %v1279_v29  ;;  %v1301_v27 = vmul.f32 1.442695, %v1287_v48  ;;  %v3469_v47 = vpop.eup %2520  ;;  %v3471_v5 = vadd.f32 %v1044_v8, %v1019_v34  ;;  %v3695_v31 = vunpack.c.l.bf16 %v3016_v46 }
 0x126   : > { %2540 = vpow2.f32 %v1303_v3  ;;  %v1013_v26 = vmul.f32 %v3220_v60, %v3225_v58  ;;  %v3480_v11 = vpop.eup %2522  ;;  %v3696_v21 = vunpack.c.h.bf16 %v3140_v63  ;;  %v3697_v0 = vunpack.c.h.bf16 %v3016_v46 }
 0x127   : > { %v3476_v2 = vmul.f32 %v3410_v18, %v3695_v31  ;;  %2542 = vpow2.f32 %v1277_v32  ;;  %v1014_v49 = vmul.f32 %v3206_v54, %v3233_v51  ;;  %v2525_v33 = vpop.eup %2524  ;;  %v1164_v62 = vadd.f32 %v2517_v15, %v1156_v40 }
 0x128   : > { %v3484_v41 = vmul.f32 %v2517_v15, %v3696_v21  ;;  %v3489_v28 = vmul.f32 %v3400_v19, %v3697_v0  ;;  %2544 = vrcp.f32 %v1315_v10  ;;  %v3698_v58 = vunpack.c.l.bf16 %v3140_v63  ;;  %v2527_v44 = vpop.eup %2526  ;;  %v3701_v10 = vld [vmem:[#allocation13_spill] sm:$0xff]  ;;  %v3706_v0 = vld [vmem:[#allocation14_spill] sm:$0xff] }
 0x129   : > { %v3699_v61 = vunpack.c.l.bf16 %v3032_v55  ;;  %v1163_v16 = vadd.f32 %v2519_v35, %v1155_v59  ;;  %v1158_v34 = vmul.f32 %v3469_v47, %v1012_v56  ;;  %2546 = vpow2.f32 %v1301_v27  ;;  %v2529_v42 = vpop.eup %2528 }
 0x12a   : > { %v1196_v60 = vmul.f32 %v2519_v35, %v3698_v58  ;;  %v1305_v29 = vmul.f32 %v3404_v50, %v3322_v22  ;;  %v1157_v51 = vmul.f32 %v3480_v11, %v1011_v30  ;;  %v1310_v54 = vmul.f32 %v2527_v44, %v1164_v62  ;;  %v2531_v8 = vpop.eup %2530  ;;  %v3702_v30 = vld [vmem:[#allocation11_spill] sm:$0xff] }
 0x12b   : > { %v1331_v57 = vmul.f32 %v2513_v43, %v3699_v61  ;;  %v1046_v12 = vadd.f32 %v3244_v39, %v1013_v26  ;;  %v1306_v63 = vmul.f32 %v3394_v6, %v3315_v14  ;;  %v1047_v43 = vadd.f32 %v3240_v53, %v1014_v49  ;;  %v2533_v56 = vpop.eup %2532 }
 0x12c   : > { %v1313_v3 = vadd.f32 %v3410_v18, %v1305_v29  ;;  %v1169_v48 = vmul.f32 %v3305_v37, %v3312_v9  ;;  %v1170_v22 = vmul.f32 %v3287_v7, %v3294_v45  ;;  %v1318_v32 = vadd.f32 %v2531_v8, %v1310_v54  ;;  %v2535_v35 = vpop.eup %2534  ;;  %v3704_v37 = vld [vmem:[#allocation12_spill] sm:$0xff]  ;;  %v3707_v54 = vld [vmem:[#allocation10_spill] sm:$0xff] }
 0x12d   : > { %v1167_v15 = vmul.f32 %v3282_v36, %v1046_v12  ;;  %v3700_v39 = vunpack.c.l.bf16 %v3160_v25  ;;  %v1314_v14 = vadd.f32 %v3400_v19, %v1306_v63  ;;  %v1309_v53 = vmul.f32 %v2533_v56, %v1163_v16 }
 0x12e   : > { %v1168_v18 = vmul.f32 %v3702_v30, %v1047_v43  ;;  %v3703_v59 = vunpack.c.h.bf16 %v3160_v25  ;;  %2548 = vrcp.f32 %v1313_v3  ;;  %v2537_v45 = vpop.eup %2536  ;;  %v1166_v7 = vadd.f32 %v2525_v33, %v1158_v34 }
 0x12f   : > { %v1192_v40 = vmul.f32 %v3701_v10, %v3700_v39  ;;  %2550 = vrcp.f32 %v1318_v32  ;;  %v3705_v36 = vunpack.c.h.bf16 %v3032_v55  ;;  %v1202_v31 = vadd.f32 %v3359_v1, %v1169_v48  ;;  %v2539_v26 = vpop.eup %2538  ;;  %v3710_v32 = vld [vmem:[#allocation8_spill] sm:$0xff] }
 0x130   : > { %v1193_v9 = vmul.f32 %v3704_v37, %v3703_v59  ;;  %v1165_v19 = vadd.f32 %v2529_v42, %v1157_v51  ;;  %v1317_v21 = vadd.f32 %v2537_v45, %v1309_v53  ;;  %2552 = vrcp.f32 %v1314_v14  ;;  %v2541_v62 = vpop.eup %2540  ;;  %v3713_v37 = vld [vmem:[#allocation9_spill] sm:$0xff] }
 0x131   : > { %v1332_v27 = vmul.f32 %v3439_v24, %v3705_v36  ;;  %v1203_v49 = vadd.f32 %v3706_v0, %v1170_v22  ;;  %v1312_v25 = vmul.f32 %v2539_v26, %v1166_v7  ;;  %v1200_v58 = vadd.f32 %v1192_v40, %v1167_v15  ;;  %v2543_v34 = vpop.eup %2542 }
 0x132   : > { %v1323_v61 = vmul.f32 %v3445_v13, %v1202_v31  ;;  %v1171_v16 = vmul.f32 %v3458_v20, %v3461_v4  ;;  %2554 = vrcp.f32 %v1317_v21  ;;  %v1201_v29 = vadd.f32 %v1193_v9, %v1168_v18  ;;  %v2545_v51 = vpop.eup %2544 }
 0x133   : > { %v1324_v24 = vmul.f32 %v3433_v23, %v1203_v49  ;;  %v1172_v1 = vmul.f32 %v3452_v52, %v3416_v38  ;;  %v3708_v12 = vunpack.c.h.bf16 %v3707_v54  ;;  %v1320_v43 = vadd.f32 %v2541_v62, %v1312_v25  ;;  %v2547_v13 = vpop.eup %2546 }
 0x134   : > { %v1311_v3 = vmul.f32 %v2543_v34, %v1165_v19  ;;  %v1321_v48 = vmul.f32 %v3404_v50, %v1200_v58  ;;  %v3709_v22 = vunpack.c.l.bf16 %v3707_v54  ;;  %v1322_v4 = vmul.f32 %v3394_v6, %v1201_v29 }
 0x135   : > { %v1199_v63 = vmul.f32 %v2525_v33, %v3708_v12  ;;  %v3711_v15 = vunpack.c.h.bf16 %v3710_v32  ;;  %v1205_v39 = vadd.f32 %v3484_v41, %v1172_v1  ;;  %2556 = vrcp.f32 %v1320_v43 }
 0x136   : > { %v1198_v20 = vmul.f32 %v2529_v42, %v3709_v22  ;;  %v1319_v38 = vadd.f32 %v2547_v13, %v1311_v3  ;;  %v1339_v52 = vadd.f32 %v1331_v57, %v1323_v61  ;;  %v1204_v33 = vadd.f32 %v1196_v60, %v1171_v16  ;;  %v3547_v57 = vld [vmem:[%s3013_s27 + $0x78] sm:$0xff]   ;;  %s1781_s27 = sld [smem:[#allocation2]] }
 0x137   : > { %v1334_v23 = vmul.f32 %v2531_v8, %v3711_v15  ;;  %v1340_v10 = vadd.f32 %v1332_v27, %v1324_v24  ;;  %v1326_v40 = vmul.f32 %v2527_v44, %v1205_v39  ;;  %v1173_v50 = vmul.f32 %v3480_v11, %v3471_v5 }
 0x138   : > { %v1174_v42 = vmul.f32 %v3469_v47, %v3463_v17  ;;  %2558 = vrcp.f32 %v1319_v38  ;;  %v1337_v6 = vadd.f32 %v3476_v2, %v1321_v48  ;;  %v3712_v8 = vunpack.c.l.bf16 %v3710_v32  ;;  %v2549_v53 = vpop.eup %2548 }
 0x139   : > { %v1325_v41 = vmul.f32 %v2533_v56, %v1204_v33  ;;  %v1355_v30 = vmul.f32 %v2545_v51, %v1339_v52  ;;  %v1356_v18 = vmul.f32 %v2535_v35, %v1340_v10  ;;  %v730_v60 = vunpack.c.l.bf16 %v3547_v57  ;;  %v2551_v59 = vpop.eup %2550 }
 0x13a   : > { %v1333_v14 = vmul.f32 %v2537_v45, %v3712_v8  ;;  %v1207_v44 = vadd.f32 %v1199_v63, %v1174_v42  ;;  %v1338_v5 = vadd.f32 %v3489_v28, %v1322_v4  ;;  %v1353_v11 = vmul.f32 %v2549_v53, %v1337_v6  ;;  %v2553_v47 = vpop.eup %2552  ;;  %v1766_v6 = vpop.xlane.xlu0 %1765 }
 0x13b   : > { %v1342_v17 = vadd.f32 %v1334_v23, %v1326_v40  ;;  %v3714_v2 = vunpack.c.h.bf16 %v3713_v37  ;;  %v1206_v7 = vadd.f32 %v1198_v20, %v1173_v50  ;;  %v1370_v31 = vpack.c.bf16 %v1356_v18, %v1355_v30  ;;  %v1768_v8 = vpop.xlane.xlu1 %1767 }
 0x13c   : > { %v1328_v45 = vmul.f32 %v2539_v26, %v1207_v44  ;;  %v1354_v56 = vmul.f32 %v2553_v47, %v1338_v5  ;;  %v1341_v36 = vadd.f32 %v1333_v14, %v1325_v41  ;;  %v2555_v35 = vpop.eup %2554  ;;  %v1335_v19 = vmul.f32 %v2547_v13, %v730_v60 }
 0x13d   : > { %v1336_v9 = vmul.f32 %v2541_v62, %v3714_v2  ;;  %v1358_v27 = vmul.f32 %v2551_v59, %v1342_v17  ;;  %v1327_v21 = vmul.f32 %v2543_v34, %v1206_v7  ;;  %v1782_v41 = vstv %s1781_s27  ;;  %s2599_s27 = scalar_lea.vmem %s2598_s11, 2048 }
 0x13e   : > { %v1369_v0 = vpack.c.bf16 %v1354_v56, %v1353_v11  ;;  %v1357_v49 = vmul.f32 %v2555_v35, %v1341_v36  ;;  %v1770_v14 = vpop.xlane.xlu0 %1769  ;;  %v1783_v44 = vadd.f32 %v1782_v41, %v1766_v6  ;;  %v1784_v11 = vadd.f32 %v1782_v41, %v1768_v8  ;;  %p2601_p4 = scmp.lt.s32.totalorder %s2599_s27, %s2593_s26 }
 0x13f   : > { %v1344_v28 = vadd.f32 %v1336_v9, %v1328_v45  ;;  %v2557_v25 = vpop.eup %2556  ;;  %v1343_v61 = vadd.f32 %v1335_v19, %v1327_v21  ;;  %v1772_v53 = vpop.xlane.xlu1 %1771  ;;  %v1785_v18 = vadd.f32 %v1782_v41, %v1770_v14  ;;  %v3715_v14 = vunpack.c.l.bf16 %v3032_v55 }
 0x140   : > { %2329 = vmatprep.mubr.bf16.mxu1 %v1369_v0  ;;  %v1371_v58 = vpack.c.bf16 %v1358_v27, %v1357_v49  ;;  %v1786_v5 = vadd.f32 %v1782_v41, %v1772_v53  ;;  %v2087_v47 = vmul.f32 -1.442695, %v1783_v44  ;;  %v2088_v7 = vmul.f32 -1.442695, %v1784_v11  ;;  %p2602_p5 = por %p2601_p4, %p2600_p3 }
 0x141   : > { %2330 = vmatmul.mubr.bf16.vlgmr.msra.gmra.mrb[0].mxu1 %v1370_v31  ;;  %v1360_v62 = vmul.f32 %v2557_v25, %v1344_v28  ;;  %v2089_v17 = vmul.f32 -1.442695, %v1785_v18  ;;  %v3716_v18 = vunpack.c.l.bf16 %v3016_v46  ;;  %v3717_v11 = vunpack.c.h.bf16 %v3032_v55 }
 0x142   : > { %v2559_v16 = vpop.eup %2558  ;;  %2333 = vmatprep.mubr.bf16.mxu1 %v1371_v58  ;;  %v1774_v30 = vpop.xlane.xlu0 %1773  ;;  %v2090_v9 = vmul.f32 -1.442695, %v1786_v5  ;;  %v3721_v57 = vunpack.c.h.bf16 %v3710_v32  ;;  %p2603_p7 = pnand %p2602_p5, %p2596_p2 }
 0x143   : > { %v1359_v26 = vmul.f32 %v2559_v16, %v1343_v61  ;;  %v1776_v59 = vpop.xlane.xlu1 %1775  ;;  %2560 = vpow2.f32 %v2089_v17  ;;  %v1787_v27 = vadd.f32 %v1782_v41, %v1774_v30 }
 0x144   : > { %2562 = vpow2.f32 %v2087_v47  ;;  %v1788_v31 = vadd.f32 %v1782_v41, %v1776_v59 }
 0x145   : > { %v1372_v29 = vpack.c.bf16 %v1360_v62, %v1359_v26  ;;  %2564 = vpow2.f32 %v2090_v9  ;;  %v2091_v21 = vmul.f32 -1.442695, %v1787_v27 }
 0x146   : > { %v1778_v2 = vpop.xlane.xlu0 %1777  ;;  %2566 = vpow2.f32 %v2088_v7  ;;  %v2092_v0 = vmul.f32 -1.442695, %v1788_v31 }
 0x147   : > { %v1780_v45 = vpop.xlane.xlu1 %1779  ;;  %v1789_v56 = vadd.f32 %v1782_v41, %v1778_v2  ;;  %v3718_v2 = vunpack.c.h.bf16 %v3016_v46 }
 0x148   : > { %v1790_v36 = vadd.f32 %v1782_v41, %v1780_v45 }
 0x149   : > { %2334 = vmatmul.mubr.bf16.gmra.mrb[4].mxu1 %v1372_v29  ;;  %v2093_v35 = vmul.f32 -1.442695, %v1789_v56 }
 0x14a   : > { %v2094_v19 = vmul.f32 -1.442695, %v1790_v36 }
 0x14b   : > { %2568 = vpow2.f32 %v2093_v35 }
 0x14c   : > { %2570 = vpow2.f32 %v2094_v19 }
 0x14d   : > { %v2561_v49 = vpop.eup %2560  ;;  %2572 = vpow2.f32 %v2091_v21 }
 0x14e   : > { %v2277_v24 = vpop.f32.mrb[0].mxu0  ;;  %v2563_v28 = vpop.eup %2562  ;;  %v1817_v61 = vadd.f32 1.0, %v2561_v49  ;;  %2574 = vpow2.f32 %v2092_v0 }
 0x14f   : > { %v2278_v1 = vpop.f32.mrb[1].mxu0  ;;  %v2565_v25 = vpop.eup %2564  ;;  %v1815_v62 = vadd.f32 1.0, %v2563_v28 }
 0x150   : > { %v3555_v51 = vadd.f32 %v2278_v1, %v2277_v24  ;;  %v2280_v54 = vpop.f32.mrb[2].mxu0  ;;  %v2567_v58 = vpop.eup %2566  ;;  %v1818_v16 = vadd.f32 1.0, %v2565_v25  ;;  %2576 = vrcp.f32 %v1817_v61 }
 0x151   : > { %v2281_v34 = vpop.f32.mrb[3].mxu0  ;;  %v1816_v26 = vadd.f32 1.0, %v2567_v58  ;;  %2578 = vrcp.f32 %v1815_v62 }
 0x152   : > { %v3557_v12 = vadd.f32 %v2281_v34, %v2280_v54  ;;  %2580 = vrcp.f32 %v1818_v16  ;;  %v2061_v34 = vld [vmem:[%s3663_s4] ss:$0 sm:$0xff] }
 0x153   : > { %2582 = vrcp.f32 %v1816_v26 }
 0x154   : > { %v1658_v8 = vadd.f32 %v3557_v12, %v2061_v34 }
 0x155   : > { %v2569_v29 = vpop.eup %2568 }
 0x156   : > { %v2283_v63 = vpop.f32.mrb[4].mxu0  ;;  %v2571_v24 = vpop.eup %2570  ;;  %v1821_v54 = vadd.f32 1.0, %v2569_v29 }
 0x157   : > { %v2284_v43 = vpop.f32.mrb[5].mxu0  ;;  %v2573_v1 = vpop.eup %2572 }
 0x158   : > { %v3559_v3 = vadd.f32 %v2284_v43, %v2283_v63  ;;  %v2286_v48 = vpop.f32.mrb[6].mxu0  ;;  %v2575_v43 = vpop.eup %2574  ;;  %2584 = vrcp.f32 %v1821_v54 }
 0x159   : > { %v2287_v13 = vpop.f32.mrb[7].mxu0 }
 0x15a   : > { %v3561_v22 = vadd.f32 %v2287_v13, %v2286_v48  ;;  %v1663_v63 = vadd.f32 %v3559_v3, %v2061_v34  ;;  %v1822_v48 = vadd.f32 1.0, %v2571_v24  ;;  %v1819_v13 = vadd.f32 1.0, %v2573_v1 }
 0x15b   : > { %v3720_v24 = vunpack.c.h.bf16 %v3713_v37 }
 0x15c   : > { %2586 = vrcp.f32 %v1822_v48 }
 0x15d   : > { %2588 = vrcp.f32 %v1819_v13 }
 0x15e   : > { %v2289_v20 = vpop.f32.mrb[8].mxu0 }
 0x15f   : > { %v2290_v4 = vpop.f32.mrb[9].mxu0 }
 0x160   : > { %v3563_v15 = vadd.f32 %v2290_v4, %v2289_v20  ;;  %v2292_v23 = vpop.f32.mrb[10].mxu0  ;;  %v1655_v4 = vadd.f32 %v3555_v51, %v2061_v34 }
 0x161   : > { %v2293_v39 = vpop.f32.mrb[11].mxu0 }
 0x162   : > { %v3565_v38 = vadd.f32 %v2293_v39, %v2292_v23  ;;  %v1820_v23 = vadd.f32 1.0, %v2575_v43  ;;  %v1671_v35 = vadd.f32 %v3563_v15, %v2061_v34 }
 0x164   : > { %2590 = vrcp.f32 %v1820_v23  ;;  %v1674_v15 = vadd.f32 %v3565_v38, %v2061_v34 }
 0x166   : > { %v2295_v52 = vpop.f32.mrb[12].mxu0 }
 0x167   : > { %v2296_v33 = vpop.f32.mrb[13].mxu0 }
 0x168   : > { %v3567_v10 = vadd.f32 %v2296_v33, %v2295_v52  ;;  %v2298_v40 = vpop.f32.mrb[14].mxu0  ;;  %v1666_v33 = vadd.f32 %v3561_v22, %v2061_v34 }
 0x169   : > { %v2299_v50 = vpop.f32.mrb[15].mxu0 }
 0x16a   : > { %v3569_v42 = vadd.f32 %v2299_v50, %v2298_v40  ;;  %v2577_v40 = vpop.eup %2576  ;;  %v1679_v12 = vadd.f32 %v3567_v10, %v2061_v34 }
 0x16b   : > { %v2579_v3 = vpop.eup %2578 }
 0x16c   : > { %v2581_v51 = vpop.eup %2580  ;;  %v1682_v46 = vadd.f32 %v3569_v42, %v2061_v34  ;;  %v3719_v42 = vunpack.c.l.bf16 %v3710_v32 }
 0x16d   : > { %v2583_v22 = vpop.eup %2582 }
 0x16e   : > { %v2585_v19 = vpop.eup %2584 }
 0x16f   : > { %v2587_v61 = vpop.eup %2586 }
 0x170   : > { %v2589_v26 = vpop.eup %2588 }
 0x171   : > { %v2591_v54 = vpop.eup %2590 }
 0x214   : > { %v2331_v20 = vpop.f32.mrb[0].mxu1 }
 0x215   : > { %v1728_v39 = vadd.f32 %v2331_v20, %v1663_v63  ;;  %v1719_v52 = vpop.f32.mrb[1].mxu1 }
 0x216   : > { %v1720_v50 = vadd.f32 %v1719_v52, %v1655_v4  ;;  %v2332_v6 = vpop.f32.mrb[2].mxu1 }
 0x217   : > { %v1841_v41 = vsub.f32 %v3715_v14, %v1728_v39  ;;  %v1731_v53 = vadd.f32 %v2332_v6, %v1666_v33  ;;  %v1722_v30 = vpop.f32.mrb[3].mxu1 }
 0x218   : > { %v1839_v44 = vsub.f32 %v3716_v18, %v1720_v50  ;;  %v1723_v59 = vadd.f32 %v1722_v30, %v1658_v8 }
 0x219   : > { %v1849_v5 = vmul.f32 %v2577_v40, %v1841_v41  ;;  %v1842_v17 = vsub.f32 %v3717_v11, %v1731_v53 }
 0x21a   : > { %v1847_v47 = vmul.f32 %v2579_v3, %v1839_v44  ;;  %v1840_v9 = vsub.f32 %v3718_v2, %v1723_v59 }
 0x21b   : > { %v1857_v7 = vadd.f32 %v1849_v5, %v1728_v39  ;;  %v1850_v45 = vmul.f32 %v2581_v51, %v1842_v17 }
 0x21c   : > { %v1855_v56 = vadd.f32 %v1847_v47, %v1720_v50  ;;  %v1848_v36 = vmul.f32 %v2583_v22, %v1840_v9  ;;  %v2335_v27 = vpop.f32.mrb[4].mxu1 }
 0x21d   : > { %1865 = vst [vmem:[%s3589_s20 + $0x10] sm:$0xff] %v1857_v7  ;;  %v1858_v55 = vadd.f32 %v1850_v45, %v1731_v53  ;;  %v1744_v10 = vadd.f32 %v2335_v27, %v1679_v12  ;;  %v1735_v31 = vpop.f32.mrb[5].mxu1 }
 0x21e   : > { %1863 = vst [vmem:[%s3589_s20] sm:$0xff] %v1855_v56  ;;  %v1856_v21 = vadd.f32 %v1848_v36, %v1723_v59  ;;  %v1736_v0 = vadd.f32 %v1735_v31, %v1671_v35  ;;  %v2336_v49 = vpop.f32.mrb[6].mxu1 }
 0x21f   : > { %1866 = vst [vmem:[%s3589_s20 + $0x18] sm:$0xff] %v1858_v55  ;;  %v1845_v28 = vsub.f32 %v730_v60, %v1744_v10  ;;  %v1747_v25 = vadd.f32 %v2336_v49, %v1682_v46  ;;  %v1738_v58 = vpop.f32.mrb[7].mxu1 }
 0x220   : > { %1864 = vst [vmem:[%s3589_s20 + $0x8] sm:$0xff] %v1856_v21  ;;  %v1843_v62 = vsub.f32 %v3719_v42, %v1736_v0  ;;  %v1739_v16 = vadd.f32 %v1738_v58, %v1674_v15 }
 0x221   : > { %v1853_v29 = vmul.f32 %v2585_v19, %v1845_v28  ;;  %v1846_v1 = vsub.f32 %v3720_v24, %v1747_v25 }
 0x222   : > { %v1851_v38 = vmul.f32 %v2589_v26, %v1843_v62  ;;  %v1844_v60 = vsub.f32 %v3721_v57, %v1739_v16 }
 0x223   : > { %v1861_v34 = vadd.f32 %v1853_v29, %v1744_v10  ;;  %v1854_v63 = vmul.f32 %v2587_v61, %v1846_v1 }
 0x224   : > { %v1859_v43 = vadd.f32 %v1851_v38, %v1736_v0  ;;  %v1852_v48 = vmul.f32 %v2591_v54, %v1844_v60 }
 0x225   : > { %1869 = vst [vmem:[%s3589_s20 + $0x30] sm:$0xff] %v1861_v34  ;;  %v1862_v13 = vadd.f32 %v1854_v63, %v1747_v25 }
 0x226   : > { %1867 = vst [vmem:[%s3589_s20 + $0x20] sm:$0xff] %v1859_v43  ;;  %v1860_v32 = vadd.f32 %v1852_v48, %v1739_v16 }
 0x227   : > { %1870 = vst [vmem:[%s3589_s20 + $0x38] sm:$0xff] %v1862_v13 }
 0x228   : > { %1868 = vst [vmem:[%s3589_s20 + $0x28] sm:$0xff] %v1860_v32 }
 0x229   : > { %2606 = shalt.err (!%p2603_p7)
}
 0x22a   : > { %s2607_s13 = scalar_lea.hbm %s3611_s25, 1024  ;;  %s2611_s20 = scalar_lea.hbm %s3667_s8, 4096 }
 0x22b   : > { %p2608_p9 = scmp.ne.s32.totalorder %s3611_s25, %s2607_s13  ;;  %p2612_p12 = scmp.lt.u32.totalorder %s3611_s25, %s3667_s8 }
 0x22c   : > { %p2613_p13 = scmp.lt.u32.totalorder %s2611_s20, %s2607_s13  ;;  %p2615_p1 = scmp.lt.u32.totalorder %s2607_s13, %s3611_s25 }
 0x22d   : > { %p2609_p10 = pnand %p2608_p9, %p2751_p6 }
 0x22e   : > { %p2614_p0 = por %p2613_p13, %p2612_p12 }
 0x22f   : > { %p2610_p11 = pneg %p2609_p10 }
 0x230   : > { %p2616_p2 = por %p2615_p1, %p2614_p0 }
 0x232   : > { %p2617_p3 = pnand %p2616_p2, %p2610_p11 }
 0x234   : > { %2620 = shalt.err (!%p2617_p3)
}
 0x235   : > { %s2658_s24 = smov 128   ;;  %s2659_s26 = smov 8  }
 0x236   : > { %2339 = dma.vmem_to_hbm [thread:$0]  (%p2751_p6), %s3613_s22, 1024, %s3611_s25, %s1872_s7, %s2658_s24, %s2658_s24, %s2659_s26  }
 0x237 PF: > { %p2345_p4 = scmp.ge.s32.totalorder %s2655_s10, 2  ;;  %s1900_s28 = sand.u32 1, %s2643_s29  }
 0x238   : > { %s1901_s11 = scalar_lea.sflag [#allocation6], %s1900_s28 }
 0x239   : > { %p2342_p5 = pnand %p2345_p4, %p2755_p8 }
 0x23b   : > { %2638 = dma.done.wait (!%p2342_p5), %s1901_s11, 1024  }
 0x23c   : > { %2640 = vsyncadd (!%p2342_p5), %s1901_s11, 4294966272  ;;  %p19_p7 = scmp.ge.s32.totalorder %s2733_s12, 6   ;;  %s3722_s29 = smov %s2647_s30 }
 0x23d   : > { %s3723_s30 = smov %s2651_s9  ;;  %s3724_s9 = smov %s2745_s15 }
 0x23e   : > { %s3725_s10 = smov %s2733_s12  ;;  %21 = sbr.rel (!%p19_p7) target bundleno = 5 (0x5), region = 192 }
 0x245   :  { %1906 = vsyncpa [#allocation6], 1 }
 0x246   :  { %1908 = vsyncpa [#allocation6 + $0x1], 1 }

</bundles_post_ra>
